<compile_context>
chip_gen: v7x
topology: tpu7x:2x2x1
jax: 0.10.0
libtpu: 0.0.40
codegen_flags: <defaults>
</compile_context>

<pallas_src>
import functools

import jax
import jax.numpy as jnp
from jax import lax
from jax.experimental import pallas as pl
from jax.experimental.pallas import tpu as pltpu

KH = KW = 3  # conv kernel size (padding = 1 -> "same")


def _fused_norm_conv0_kernel(scale_ref, offset_ref, w_ref, b_ref,
                             x_ref, top_ref, bot_ref, o_ref, *, true_w):
    """Fused normalize + 3x3 'same' conv (output channel 0 only) on one row tile.

    scale_ref:  SMEM (Cin,)          1 / (255 * std)
    offset_ref: SMEM (Cin,)          -mean / std
    w_ref:      SMEM (Cin*9,)        conv weights of output channel 0 (ci,kh,kw)
    b_ref:      SMEM (1,)            conv bias of output channel 0
    x_ref:      VMEM (1, Cin, TH, Wp) uint8   current row tile
    top_ref:    VMEM (1, 1, Cin, Wp)  uint8   image row just above the tile
    bot_ref:    VMEM (1, 1, Cin, Wp)  uint8   image row just below the tile
    o_ref:      VMEM (1, TH, Wp)      float32
    true_w:     static int, original (unpadded) image width
    """
    _, cin, th, wp = x_ref.shape
    t = pl.program_id(1)
    n_t = pl.num_programs(1)

    # Is the halo row a real image row (1.0) or zero padding (0.0)?
    top_f = (t > 0).astype(jnp.float32)
    bot_f = (t < n_t - 1).astype(jnp.float32)

    # Border predicates (cheap: 2 iotas + 4 compares per grid step, hoisted out
    # of the channel loop; no per-channel f32 mask materialization).
    col = lax.broadcasted_iota(jnp.int32, (th, wp), 1)
    row = lax.broadcasted_iota(jnp.int32, (th, wp), 0)
    left_ok = col >= 1                 # tap at column c-1 is inside the image
    right_ok = col <= true_w - 2       # tap at column c+1 is inside the image
    left_ok1 = left_ok[:1, :]          # (1, Wp) versions for the halo rows
    right_ok1 = right_ok[:1, :]
    is_first = row == 0                # tile row that needs the top halo
    is_last = row == th - 1            # tile row that needs the bottom halo

    acc = jnp.full((th, wp), b_ref[0], dtype=jnp.float32)

    def col_shifts(z, lmask, rmask):
        # z[:, c-1] / z[:, c] / z[:, c+1], zero-padded at the true image border.
        zl = jnp.where(lmask, pltpu.roll(z, shift=1, axis=1), 0.0)
        zr = jnp.where(rmask, pltpu.roll(z, shift=wp - 1, axis=1), 0.0)
        return zl, z, zr

    for ci in range(cin):
        sc = scale_ref[ci]
        off = offset_ref[ci]

        # (x / 255 - mean) / std  ==  u8->f32 * scale + offset  (cast + one FMA)
        xm = x_ref[0, ci, :, :].astype(jnp.float32) * sc + off          # (TH, Wp)
        xt = top_ref[0, 0, ci:ci + 1, :].astype(jnp.float32) * sc + off  # (1, Wp)
        xb = bot_ref[0, 0, ci:ci + 1, :].astype(jnp.float32) * sc + off  # (1, Wp)

        # Column (lane) shifts: computed once per channel, reused by all three
        # kernel rows (XLU rolls; VPU/DMA stay the bottleneck).
        ml, mc, mr = col_shifts(xm, left_ok, right_ok)
        tl, tc, tr = col_shifts(xt, left_ok1, right_ok1)
        bl, bc, br = col_shifts(xb, left_ok1, right_ok1)

        for dh in (-1, 0, 1):
            kh = dh + 1
            base = ci * (KH * KW) + kh * KW
            wl, wc_, wr = w_ref[base + 0], w_ref[base + 1], w_ref[base + 2]

            inner = ml * wl + mc * wc_ + mr * wr                         # (TH, Wp)
            if dh == 0:
                acc = acc + inner
            elif dh == -1:
                # rolled[r] = inner[r-1]; patch row 0 with the top halo row.
                inner_t = (tl * wl + tc * wc_ + tr * wr) * top_f         # (1, Wp)
                rolled = pltpu.roll(inner, shift=1, axis=0)
                acc = acc + jnp.where(is_first, inner_t, rolled)
            else:
                # rolled[r] = inner[r+1]; patch row TH-1 with the bottom halo.
                inner_b = (bl * wl + bc * wc_ + br * wr) * bot_f         # (1, Wp)
                rolled = pltpu.roll(inner, shift=th - 1, axis=0)
                acc = acc + jnp.where(is_last, inner_b, rolled)

    o_ref[0, :, :] = acc


def _choose_tile_h(h, wp, cin, budget_bytes=10 * 1024 * 1024):
    """Pick a row-tile height that keeps the pipelined working set well under
    the default scoped VMEM limit on every TPU generation (v5e: 16 MiB)."""
    if h <= 128:
        return h
    # per output row: double-buffered u8 input + double-buffered f32 output
    # + ~8 live f32 (row, Wp) temporaries inside the kernel body.
    per_row = 2 * cin * wp + 2 * 4 * wp + 8 * 4 * wp
    cap = max(32, budget_bytes // per_row)
    th = (min(cap, h) // 32) * 32          # uint8-friendly sublane multiple
    while th >= 32:
        if h % th == 0:
            return th
        th -= 32
    return h  # fall back to the full image (correct; only tight at huge H)


@functools.partial(jax.jit, static_argnames=("tile_h",))
def model_wrapper_text_detection(x_u8, mean, std, weight, bias, *, tile_h=None):
    """x_u8: (B, Cin, H, W) uint8 image (NCHW).  Returns (B, H, W) float32."""
    b, cin, h, w = x_u8.shape
    wp = ((w + 127) // 128) * 128          # lane-dense width (multiple of 128)

    if tile_h is None:
        tile_h = _choose_tile_h(h, wp, cin)
    th = int(tile_h)
    if h % th != 0 or (th != h and th % 32 != 0):
        raise ValueError(f"tile_h={th} must divide H={h} and be a multiple of "
                         "32 (or equal to H).")
    n_t = h // th

    # Fused normalization constants (exact within fp tolerance).
    scale = (1.0 / (255.0 * std)).astype(jnp.float32)     # (Cin,)
    offset = (-mean / std).astype(jnp.float32)            # (Cin,)

    # Only output channel 0 is ever consumed -> prune weights/bias up front.
    w0 = weight[0].reshape(-1).astype(jnp.float32)        # (Cin * 9,)
    b0 = bias[:1].astype(jnp.float32)                     # (1,)

    # Lane-dense padding of W (uint8 zeros; true-border masking happens in
    # the kernel against the original W, so padded columns never leak in).
    xp = x_u8 if wp == w else jnp.pad(
        x_u8, ((0, 0), (0, 0), (0, 0), (0, wp - w)))

    # Pre-gathered 1-row halos per tile: (B, nT, Cin, Wp) uint8 (tiny).
    tile_ids = jnp.arange(n_t)
    top_idx = jnp.maximum(tile_ids * th - 1, 0)           # row above each tile
    bot_idx = jnp.minimum((tile_ids + 1) * th, h - 1)     # row below each tile
    top_rows = jnp.transpose(xp[:, :, top_idx, :], (0, 2, 1, 3))
    bot_rows = jnp.transpose(xp[:, :, bot_idx, :], (0, 2, 1, 3))

    smem_spec = pl.BlockSpec(memory_space=pltpu.MemorySpace.SMEM)
    kernel = functools.partial(_fused_norm_conv0_kernel, true_w=w)

    out = pl.pallas_call(
        kernel,
        out_shape=jax.ShapeDtypeStruct((b, h, wp), jnp.float32),
        grid_spec=pltpu.PrefetchScalarGridSpec(
            num_scalar_prefetch=0,
            grid=(b, n_t),
            in_specs=[
                smem_spec,                                                # scale
                smem_spec,                                                # offset
                smem_spec,                                                # weight[0] flat
                smem_spec,                                                # bias[0]
                pl.BlockSpec((1, cin, th, wp), lambda i, j: (i, 0, j, 0)),  # x tile (u8)
                pl.BlockSpec((1, 1, cin, wp), lambda i, j: (i, j, 0, 0)),   # top halo
                pl.BlockSpec((1, 1, cin, wp), lambda i, j: (i, j, 0, 0)),   # bottom halo
            ],
            out_specs=pl.BlockSpec((1, th, wp), lambda i, j: (i, j, 0)),
        ),
        # Both axes parallel: batch AND row tiles shard across v7x's two TCs.
        # (For very large tiles on v6e, also set vmem_limit_bytes here.)
        compiler_params=pltpu.CompilerParams(
            dimension_semantics=("parallel", "parallel")),
    )(scale, offset, w0, b0, xp, top_rows, bot_rows)

    return out[:, :, :w] if wp != w else out   # already [:, 0, :, :]


def _reference(x_u8, mean, std, weight, bias):
    x = x_u8.astype(jnp.float32)
    xn = (x / 255.0 - mean[None, :, None, None]) / std[None, :, None, None]
    out = lax.conv_general_dilated(
        xn, weight, window_strides=(1, 1), padding=((1, 1), (1, 1)),
        dimension_numbers=("NCHW", "OIHW", "NCHW"))
    out = out + bias[None, :, None, None]
    return out[:, 0, :, :]


if __name__ == "__main__":
    key = jax.random.PRNGKey(0)
    k_x, k_w, k_b = jax.random.split(key, 3)

    # Small but non-trivial: exercises H tiling (2 tiles of 32 rows, halo
    # exchange at the seam) and W padding/masking (100 -> 128 lanes).
    B, CIN, H, W = 2, 3, 64, 100
    COUT = 4

    x = jax.random.randint(k_x, (B, CIN, H, W), 0, 256,
                           dtype=jnp.int32).astype(jnp.uint8)
    mean = jnp.array([0.485, 0.456, 0.406], dtype=jnp.float32)
    std = jnp.array([0.229, 0.224, 0.225], dtype=jnp.float32)
    weight = jax.random.normal(k_w, (COUT, CIN, KH, KW), dtype=jnp.float32) * 0.1
    bias = jax.random.normal(k_b, (COUT,), dtype=jnp.float32) * 0.01

    out = model_wrapper_text_detection(x, mean, std, weight, bias, tile_h=32)
    out = jax.block_until_ready(out)

    ref = _reference(x, mean, std, weight, bias)
    assert out.shape == (B, H, W), out.shape
    assert jnp.allclose(out, ref, atol=1e-4, rtol=1e-4), float(
        jnp.max(jnp.abs(out - ref)))

    print("KERNEL_OK")
</pallas_src>

<mosaic_0001>
module attributes {stable_mosaic.version = 11 : i64} {
  func.func @_fused_norm_conv0_kernel(%arg0: i32, %arg1: i32, %arg2: memref<3xf32, #tpu.memory_space<smem>>, %arg3: memref<3xf32, #tpu.memory_space<smem>>, %arg4: memref<27xf32, #tpu.memory_space<smem>>, %arg5: memref<1xf32, #tpu.memory_space<smem>>, %arg6: memref<1x3x32x128xi8, #tpu.memory_space<vmem>>, %arg7: memref<1x1x3x128xi8, #tpu.memory_space<vmem>>, %arg8: memref<1x1x3x128xi8, #tpu.memory_space<vmem>>, %arg9: memref<1x32x128xf32, #tpu.memory_space<vmem>>) attributes {dimension_semantics = [#tpu.dimension_semantics<parallel>, #tpu.dimension_semantics<parallel>], iteration_bounds = array<i64: 2, 2>, scalar_prefetch = 0 : i64, scratch_operands = 0 : i64, tpu.core_type = #tpu.core_type<tc>, window_params = [{transform_indices = @transform_0, window_bounds = array<i64: 3>}, {transform_indices = @transform_1, window_bounds = array<i64: 3>}, {transform_indices = @transform_2, window_bounds = array<i64: 27>}, {transform_indices = @transform_3, window_bounds = array<i64: 1>}, {transform_indices = @transform_4, window_bounds = array<i64: 1, 3, 32, 128>}, {transform_indices = @transform_5, window_bounds = array<i64: 1, 1, 3, 128>}, {transform_indices = @transform_6, window_bounds = array<i64: 1, 1, 3, 128>}, {transform_indices = @transform_7, window_bounds = array<i64: 1, 32, 128>}]} {
    %c0_i32 = arith.constant 0 : i32
    %0 = arith.cmpi sgt, %arg1, %c0_i32 : i32
    %1 = arith.extui %0 : i1 to i32
    %2 = arith.sitofp %1 : i32 to f32
    %c1_i32 = arith.constant 1 : i32
    %3 = arith.cmpi slt, %arg1, %c1_i32 : i32
    %4 = arith.extui %3 : i1 to i32
    %5 = arith.sitofp %4 : i32 to f32
    %6 = tpu.iota {dimensions = array<i32: 1>} : vector<32x128xi32>
    %7 = tpu.iota {dimensions = array<i32: 0>} : vector<32x128xi32>
    %c1_i32_0 = arith.constant 1 : i32
    %8 = vector.broadcast %c1_i32_0 : i32 to vector<32x128xi32>
    %9 = arith.cmpi sge, %6, %8 : vector<32x128xi32>
    %c98_i32 = arith.constant 98 : i32
    %10 = vector.broadcast %c98_i32 : i32 to vector<32x128xi32>
    %11 = arith.cmpi sle, %6, %10 : vector<32x128xi32>
    %12 = vector.extract_strided_slice %9 {offsets = [0, 0], sizes = [1, 128], strides = [1, 1]} : vector<32x128xi1> to vector<1x128xi1>
    %13 = vector.extract_strided_slice %11 {offsets = [0, 0], sizes = [1, 128], strides = [1, 1]} : vector<32x128xi1> to vector<1x128xi1>
    %c0_i32_1 = arith.constant 0 : i32
    %14 = vector.broadcast %c0_i32_1 : i32 to vector<32x128xi32>
    %15 = arith.cmpi eq, %7, %14 : vector<32x128xi32>
    %c31_i32 = arith.constant 31 : i32
    %16 = vector.broadcast %c31_i32 : i32 to vector<32x128xi32>
    %17 = arith.cmpi eq, %7, %16 : vector<32x128xi32>
    %c0 = arith.constant 0 : index
    %18 = memref.load %arg5[%c0] : memref<1xf32, #tpu.memory_space<smem>>
    %19 = vector.broadcast %18 : f32 to vector<32x128xf32>
    %c0_2 = arith.constant 0 : index
    %20 = memref.load %arg2[%c0_2] : memref<3xf32, #tpu.memory_space<smem>>
    %c0_3 = arith.constant 0 : index
    %21 = memref.load %arg3[%c0_3] : memref<3xf32, #tpu.memory_space<smem>>
    %c0_4 = arith.constant 0 : index
    %c0_5 = arith.constant 0 : index
    %c0_6 = arith.constant 0 : index
    %c0_7 = arith.constant 0 : index
    %22 = vector.load %arg6[%c0_4, %c0_5, %c0_6, %c0_7] : memref<1x3x32x128xi8, #tpu.memory_space<vmem>>, vector<1x1x32x128xi8>
    %23 = vector.shape_cast %22 : vector<1x1x32x128xi8> to vector<32x128xi8>
    %24 = arith.uitofp %23 : vector<32x128xi8> to vector<32x128xf32>
    %25 = vector.broadcast %20 : f32 to vector<32x128xf32>
    %26 = arith.mulf %24, %25 : vector<32x128xf32>
    %27 = vector.broadcast %21 : f32 to vector<32x128xf32>
    %28 = arith.addf %26, %27 : vector<32x128xf32>
    %c0_8 = arith.constant 0 : index
    %c0_9 = arith.constant 0 : index
    %c0_10 = arith.constant 0 : index
    %c0_11 = arith.constant 0 : index
    %29 = vector.load %arg7[%c0_8, %c0_9, %c0_10, %c0_11] : memref<1x1x3x128xi8, #tpu.memory_space<vmem>>, vector<1x1x1x128xi8>
    %30 = vector.shape_cast %29 : vector<1x1x1x128xi8> to vector<1x128xi8>
    %31 = arith.uitofp %30 : vector<1x128xi8> to vector<1x128xf32>
    %32 = vector.broadcast %20 : f32 to vector<1x128xf32>
    %33 = arith.mulf %31, %32 : vector<1x128xf32>
    %34 = vector.broadcast %21 : f32 to vector<1x128xf32>
    %35 = arith.addf %33, %34 : vector<1x128xf32>
    %c0_12 = arith.constant 0 : index
    %c0_13 = arith.constant 0 : index
    %c0_14 = arith.constant 0 : index
    %c0_15 = arith.constant 0 : index
    %36 = vector.load %arg8[%c0_12, %c0_13, %c0_14, %c0_15] : memref<1x1x3x128xi8, #tpu.memory_space<vmem>>, vector<1x1x1x128xi8>
    %37 = vector.shape_cast %36 : vector<1x1x1x128xi8> to vector<1x128xi8>
    %38 = arith.uitofp %37 : vector<1x128xi8> to vector<1x128xf32>
    %39 = vector.broadcast %20 : f32 to vector<1x128xf32>
    %40 = arith.mulf %38, %39 : vector<1x128xf32>
    %41 = vector.broadcast %21 : f32 to vector<1x128xf32>
    %42 = arith.addf %40, %41 : vector<1x128xf32>
    %c1_i32_16 = arith.constant 1 : i32
    %43 = tpu.dynamic_rotate %28 by %c1_i32_16 dim 1 : vector<32x128xf32>, i32 -> vector<32x128xf32>
    %cst = arith.constant 0.000000e+00 : f32
    %44 = vector.broadcast %cst : f32 to vector<32x128xf32>
    %45 = arith.select %9, %43, %44 : vector<32x128xi1>, vector<32x128xf32>
    %c127_i32 = arith.constant 127 : i32
    %46 = tpu.dynamic_rotate %28 by %c127_i32 dim 1 : vector<32x128xf32>, i32 -> vector<32x128xf32>
    %cst_17 = arith.constant 0.000000e+00 : f32
    %47 = vector.broadcast %cst_17 : f32 to vector<32x128xf32>
    %48 = arith.select %11, %46, %47 : vector<32x128xi1>, vector<32x128xf32>
    %c1_i32_18 = arith.constant 1 : i32
    %49 = tpu.dynamic_rotate %35 by %c1_i32_18 dim 1 : vector<1x128xf32>, i32 -> vector<1x128xf32>
    %cst_19 = arith.constant 0.000000e+00 : f32
    %50 = vector.broadcast %cst_19 : f32 to vector<1x128xf32>
    %51 = arith.select %12, %49, %50 : vector<1x128xi1>, vector<1x128xf32>
    %c127_i32_20 = arith.constant 127 : i32
    %52 = tpu.dynamic_rotate %35 by %c127_i32_20 dim 1 : vector<1x128xf32>, i32 -> vector<1x128xf32>
    %cst_21 = arith.constant 0.000000e+00 : f32
    %53 = vector.broadcast %cst_21 : f32 to vector<1x128xf32>
    %54 = arith.select %13, %52, %53 : vector<1x128xi1>, vector<1x128xf32>
    %c1_i32_22 = arith.constant 1 : i32
    %55 = tpu.dynamic_rotate %42 by %c1_i32_22 dim 1 : vector<1x128xf32>, i32 -> vector<1x128xf32>
    %cst_23 = arith.constant 0.000000e+00 : f32
    %56 = vector.broadcast %cst_23 : f32 to vector<1x128xf32>
    %57 = arith.select %12, %55, %56 : vector<1x128xi1>, vector<1x128xf32>
    %c127_i32_24 = arith.constant 127 : i32
    %58 = tpu.dynamic_rotate %42 by %c127_i32_24 dim 1 : vector<1x128xf32>, i32 -> vector<1x128xf32>
    %cst_25 = arith.constant 0.000000e+00 : f32
    %59 = vector.broadcast %cst_25 : f32 to vector<1x128xf32>
    %60 = arith.select %13, %58, %59 : vector<1x128xi1>, vector<1x128xf32>
    %c0_26 = arith.constant 0 : index
    %61 = memref.load %arg4[%c0_26] : memref<27xf32, #tpu.memory_space<smem>>
    %c1 = arith.constant 1 : index
    %62 = memref.load %arg4[%c1] : memref<27xf32, #tpu.memory_space<smem>>
    %c2 = arith.constant 2 : index
    %63 = memref.load %arg4[%c2] : memref<27xf32, #tpu.memory_space<smem>>
    %64 = vector.broadcast %61 : f32 to vector<32x128xf32>
    %65 = arith.mulf %45, %64 : vector<32x128xf32>
    %66 = vector.broadcast %62 : f32 to vector<32x128xf32>
    %67 = arith.mulf %28, %66 : vector<32x128xf32>
    %68 = arith.addf %65, %67 : vector<32x128xf32>
    %69 = vector.broadcast %63 : f32 to vector<32x128xf32>
    %70 = arith.mulf %48, %69 : vector<32x128xf32>
    %71 = arith.addf %68, %70 : vector<32x128xf32>
    %72 = vector.broadcast %61 : f32 to vector<1x128xf32>
    %73 = arith.mulf %51, %72 : vector<1x128xf32>
    %74 = vector.broadcast %62 : f32 to vector<1x128xf32>
    %75 = arith.mulf %35, %74 : vector<1x128xf32>
    %76 = arith.addf %73, %75 : vector<1x128xf32>
    %77 = vector.broadcast %63 : f32 to vector<1x128xf32>
    %78 = arith.mulf %54, %77 : vector<1x128xf32>
    %79 = arith.addf %76, %78 : vector<1x128xf32>
    %80 = vector.broadcast %2 : f32 to vector<1x128xf32>
    %81 = arith.mulf %79, %80 : vector<1x128xf32>
    %c1_i32_27 = arith.constant 1 : i32
    %82 = tpu.dynamic_rotate %71 by %c1_i32_27 dim 0 : vector<32x128xf32>, i32 -> vector<32x128xf32>
    %83 = vector.shape_cast %81 : vector<1x128xf32> to vector<1x128xf32>
    %84 = vector.broadcast %83 : vector<1x128xf32> to vector<32x128xf32>
    %85 = arith.select %15, %84, %82 : vector<32x128xi1>, vector<32x128xf32>
    %86 = arith.addf %19, %85 : vector<32x128xf32>
    %c3 = arith.constant 3 : index
    %87 = memref.load %arg4[%c3] : memref<27xf32, #tpu.memory_space<smem>>
    %c4 = arith.constant 4 : index
    %88 = memref.load %arg4[%c4] : memref<27xf32, #tpu.memory_space<smem>>
    %c5 = arith.constant 5 : index
    %89 = memref.load %arg4[%c5] : memref<27xf32, #tpu.memory_space<smem>>
    %90 = vector.broadcast %87 : f32 to vector<32x128xf32>
    %91 = arith.mulf %45, %90 : vector<32x128xf32>
    %92 = vector.broadcast %88 : f32 to vector<32x128xf32>
    %93 = arith.mulf %28, %92 : vector<32x128xf32>
    %94 = arith.addf %91, %93 : vector<32x128xf32>
    %95 = vector.broadcast %89 : f32 to vector<32x128xf32>
    %96 = arith.mulf %48, %95 : vector<32x128xf32>
    %97 = arith.addf %94, %96 : vector<32x128xf32>
    %98 = arith.addf %86, %97 : vector<32x128xf32>
    %c6 = arith.constant 6 : index
    %99 = memref.load %arg4[%c6] : memref<27xf32, #tpu.memory_space<smem>>
    %c7 = arith.constant 7 : index
    %100 = memref.load %arg4[%c7] : memref<27xf32, #tpu.memory_space<smem>>
    %c8 = arith.constant 8 : index
    %101 = memref.load %arg4[%c8] : memref<27xf32, #tpu.memory_space<smem>>
    %102 = vector.broadcast %99 : f32 to vector<32x128xf32>
    %103 = arith.mulf %45, %102 : vector<32x128xf32>
    %104 = vector.broadcast %100 : f32 to vector<32x128xf32>
    %105 = arith.mulf %28, %104 : vector<32x128xf32>
    %106 = arith.addf %103, %105 : vector<32x128xf32>
    %107 = vector.broadcast %101 : f32 to vector<32x128xf32>
    %108 = arith.mulf %48, %107 : vector<32x128xf32>
    %109 = arith.addf %106, %108 : vector<32x128xf32>
    %110 = vector.broadcast %99 : f32 to vector<1x128xf32>
    %111 = arith.mulf %57, %110 : vector<1x128xf32>
    %112 = vector.broadcast %100 : f32 to vector<1x128xf32>
    %113 = arith.mulf %42, %112 : vector<1x128xf32>
    %114 = arith.addf %111, %113 : vector<1x128xf32>
    %115 = vector.broadcast %101 : f32 to vector<1x128xf32>
    %116 = arith.mulf %60, %115 : vector<1x128xf32>
    %117 = arith.addf %114, %116 : vector<1x128xf32>
    %118 = vector.broadcast %5 : f32 to vector<1x128xf32>
    %119 = arith.mulf %117, %118 : vector<1x128xf32>
    %c31_i32_28 = arith.constant 31 : i32
    %120 = tpu.dynamic_rotate %109 by %c31_i32_28 dim 0 : vector<32x128xf32>, i32 -> vector<32x128xf32>
    %121 = vector.shape_cast %119 : vector<1x128xf32> to vector<1x128xf32>
    %122 = vector.broadcast %121 : vector<1x128xf32> to vector<32x128xf32>
    %123 = arith.select %17, %122, %120 : vector<32x128xi1>, vector<32x128xf32>
    %124 = arith.addf %98, %123 : vector<32x128xf32>
    %c1_29 = arith.constant 1 : index
    %125 = memref.load %arg2[%c1_29] : memref<3xf32, #tpu.memory_space<smem>>
    %c1_30 = arith.constant 1 : index
    %126 = memref.load %arg3[%c1_30] : memref<3xf32, #tpu.memory_space<smem>>
    %c0_31 = arith.constant 0 : index
    %c1_32 = arith.constant 1 : index
    %c0_33 = arith.constant 0 : index
    %c0_34 = arith.constant 0 : index
    %127 = vector.load %arg6[%c0_31, %c1_32, %c0_33, %c0_34] : memref<1x3x32x128xi8, #tpu.memory_space<vmem>>, vector<1x1x32x128xi8>
    %128 = vector.shape_cast %127 : vector<1x1x32x128xi8> to vector<32x128xi8>
    %129 = arith.uitofp %128 : vector<32x128xi8> to vector<32x128xf32>
    %130 = vector.broadcast %125 : f32 to vector<32x128xf32>
    %131 = arith.mulf %129, %130 : vector<32x128xf32>
    %132 = vector.broadcast %126 : f32 to vector<32x128xf32>
    %133 = arith.addf %131, %132 : vector<32x128xf32>
    %c0_35 = arith.constant 0 : index
    %c0_36 = arith.constant 0 : index
    %c1_37 = arith.constant 1 : index
    %c0_38 = arith.constant 0 : index
    %134 = vector.load %arg7[%c0_35, %c0_36, %c1_37, %c0_38] : memref<1x1x3x128xi8, #tpu.memory_space<vmem>>, vector<1x1x1x128xi8>
    %135 = vector.shape_cast %134 : vector<1x1x1x128xi8> to vector<1x128xi8>
    %136 = arith.uitofp %135 : vector<1x128xi8> to vector<1x128xf32>
    %137 = vector.broadcast %125 : f32 to vector<1x128xf32>
    %138 = arith.mulf %136, %137 : vector<1x128xf32>
    %139 = vector.broadcast %126 : f32 to vector<1x128xf32>
    %140 = arith.addf %138, %139 : vector<1x128xf32>
    %c0_39 = arith.constant 0 : index
    %c0_40 = arith.constant 0 : index
    %c1_41 = arith.constant 1 : index
    %c0_42 = arith.constant 0 : index
    %141 = vector.load %arg8[%c0_39, %c0_40, %c1_41, %c0_42] : memref<1x1x3x128xi8, #tpu.memory_space<vmem>>, vector<1x1x1x128xi8>
    %142 = vector.shape_cast %141 : vector<1x1x1x128xi8> to vector<1x128xi8>
    %143 = arith.uitofp %142 : vector<1x128xi8> to vector<1x128xf32>
    %144 = vector.broadcast %125 : f32 to vector<1x128xf32>
    %145 = arith.mulf %143, %144 : vector<1x128xf32>
    %146 = vector.broadcast %126 : f32 to vector<1x128xf32>
    %147 = arith.addf %145, %146 : vector<1x128xf32>
    %c1_i32_43 = arith.constant 1 : i32
    %148 = tpu.dynamic_rotate %133 by %c1_i32_43 dim 1 : vector<32x128xf32>, i32 -> vector<32x128xf32>
    %cst_44 = arith.constant 0.000000e+00 : f32
    %149 = vector.broadcast %cst_44 : f32 to vector<32x128xf32>
    %150 = arith.select %9, %148, %149 : vector<32x128xi1>, vector<32x128xf32>
    %c127_i32_45 = arith.constant 127 : i32
    %151 = tpu.dynamic_rotate %133 by %c127_i32_45 dim 1 : vector<32x128xf32>, i32 -> vector<32x128xf32>
    %cst_46 = arith.constant 0.000000e+00 : f32
    %152 = vector.broadcast %cst_46 : f32 to vector<32x128xf32>
    %153 = arith.select %11, %151, %152 : vector<32x128xi1>, vector<32x128xf32>
    %c1_i32_47 = arith.constant 1 : i32
    %154 = tpu.dynamic_rotate %140 by %c1_i32_47 dim 1 : vector<1x128xf32>, i32 -> vector<1x128xf32>
    %cst_48 = arith.constant 0.000000e+00 : f32
    %155 = vector.broadcast %cst_48 : f32 to vector<1x128xf32>
    %156 = arith.select %12, %154, %155 : vector<1x128xi1>, vector<1x128xf32>
    %c127_i32_49 = arith.constant 127 : i32
    %157 = tpu.dynamic_rotate %140 by %c127_i32_49 dim 1 : vector<1x128xf32>, i32 -> vector<1x128xf32>
    %cst_50 = arith.constant 0.000000e+00 : f32
    %158 = vector.broadcast %cst_50 : f32 to vector<1x128xf32>
    %159 = arith.select %13, %157, %158 : vector<1x128xi1>, vector<1x128xf32>
    %c1_i32_51 = arith.constant 1 : i32
    %160 = tpu.dynamic_rotate %147 by %c1_i32_51 dim 1 : vector<1x128xf32>, i32 -> vector<1x128xf32>
    %cst_52 = arith.constant 0.000000e+00 : f32
    %161 = vector.broadcast %cst_52 : f32 to vector<1x128xf32>
    %162 = arith.select %12, %160, %161 : vector<1x128xi1>, vector<1x128xf32>
    %c127_i32_53 = arith.constant 127 : i32
    %163 = tpu.dynamic_rotate %147 by %c127_i32_53 dim 1 : vector<1x128xf32>, i32 -> vector<1x128xf32>
    %cst_54 = arith.constant 0.000000e+00 : f32
    %164 = vector.broadcast %cst_54 : f32 to vector<1x128xf32>
    %165 = arith.select %13, %163, %164 : vector<1x128xi1>, vector<1x128xf32>
    %c9 = arith.constant 9 : index
    %166 = memref.load %arg4[%c9] : memref<27xf32, #tpu.memory_space<smem>>
    %c10 = arith.constant 10 : index
    %167 = memref.load %arg4[%c10] : memref<27xf32, #tpu.memory_space<smem>>
    %c11 = arith.constant 11 : index
    %168 = memref.load %arg4[%c11] : memref<27xf32, #tpu.memory_space<smem>>
    %169 = vector.broadcast %166 : f32 to vector<32x128xf32>
    %170 = arith.mulf %150, %169 : vector<32x128xf32>
    %171 = vector.broadcast %167 : f32 to vector<32x128xf32>
    %172 = arith.mulf %133, %171 : vector<32x128xf32>
    %173 = arith.addf %170, %172 : vector<32x128xf32>
    %174 = vector.broadcast %168 : f32 to vector<32x128xf32>
    %175 = arith.mulf %153, %174 : vector<32x128xf32>
    %176 = arith.addf %173, %175 : vector<32x128xf32>
    %177 = vector.broadcast %166 : f32 to vector<1x128xf32>
    %178 = arith.mulf %156, %177 : vector<1x128xf32>
    %179 = vector.broadcast %167 : f32 to vector<1x128xf32>
    %180 = arith.mulf %140, %179 : vector<1x128xf32>
    %181 = arith.addf %178, %180 : vector<1x128xf32>
    %182 = vector.broadcast %168 : f32 to vector<1x128xf32>
    %183 = arith.mulf %159, %182 : vector<1x128xf32>
    %184 = arith.addf %181, %183 : vector<1x128xf32>
    %185 = vector.broadcast %2 : f32 to vector<1x128xf32>
    %186 = arith.mulf %184, %185 : vector<1x128xf32>
    %c1_i32_55 = arith.constant 1 : i32
    %187 = tpu.dynamic_rotate %176 by %c1_i32_55 dim 0 : vector<32x128xf32>, i32 -> vector<32x128xf32>
    %188 = vector.shape_cast %186 : vector<1x128xf32> to vector<1x128xf32>
    %189 = vector.broadcast %188 : vector<1x128xf32> to vector<32x128xf32>
    %190 = arith.select %15, %189, %187 : vector<32x128xi1>, vector<32x128xf32>
    %191 = arith.addf %124, %190 : vector<32x128xf32>
    %c12 = arith.constant 12 : index
    %192 = memref.load %arg4[%c12] : memref<27xf32, #tpu.memory_space<smem>>
    %c13 = arith.constant 13 : index
    %193 = memref.load %arg4[%c13] : memref<27xf32, #tpu.memory_space<smem>>
    %c14 = arith.constant 14 : index
    %194 = memref.load %arg4[%c14] : memref<27xf32, #tpu.memory_space<smem>>
    %195 = vector.broadcast %192 : f32 to vector<32x128xf32>
    %196 = arith.mulf %150, %195 : vector<32x128xf32>
    %197 = vector.broadcast %193 : f32 to vector<32x128xf32>
    %198 = arith.mulf %133, %197 : vector<32x128xf32>
    %199 = arith.addf %196, %198 : vector<32x128xf32>
    %200 = vector.broadcast %194 : f32 to vector<32x128xf32>
    %201 = arith.mulf %153, %200 : vector<32x128xf32>
    %202 = arith.addf %199, %201 : vector<32x128xf32>
    %203 = arith.addf %191, %202 : vector<32x128xf32>
    %c15 = arith.constant 15 : index
    %204 = memref.load %arg4[%c15] : memref<27xf32, #tpu.memory_space<smem>>
    %c16 = arith.constant 16 : index
    %205 = memref.load %arg4[%c16] : memref<27xf32, #tpu.memory_space<smem>>
    %c17 = arith.constant 17 : index
    %206 = memref.load %arg4[%c17] : memref<27xf32, #tpu.memory_space<smem>>
    %207 = vector.broadcast %204 : f32 to vector<32x128xf32>
    %208 = arith.mulf %150, %207 : vector<32x128xf32>
    %209 = vector.broadcast %205 : f32 to vector<32x128xf32>
    %210 = arith.mulf %133, %209 : vector<32x128xf32>
    %211 = arith.addf %208, %210 : vector<32x128xf32>
    %212 = vector.broadcast %206 : f32 to vector<32x128xf32>
    %213 = arith.mulf %153, %212 : vector<32x128xf32>
    %214 = arith.addf %211, %213 : vector<32x128xf32>
    %215 = vector.broadcast %204 : f32 to vector<1x128xf32>
    %216 = arith.mulf %162, %215 : vector<1x128xf32>
    %217 = vector.broadcast %205 : f32 to vector<1x128xf32>
    %218 = arith.mulf %147, %217 : vector<1x128xf32>
    %219 = arith.addf %216, %218 : vector<1x128xf32>
    %220 = vector.broadcast %206 : f32 to vector<1x128xf32>
    %221 = arith.mulf %165, %220 : vector<1x128xf32>
    %222 = arith.addf %219, %221 : vector<1x128xf32>
    %223 = vector.broadcast %5 : f32 to vector<1x128xf32>
    %224 = arith.mulf %222, %223 : vector<1x128xf32>
    %c31_i32_56 = arith.constant 31 : i32
    %225 = tpu.dynamic_rotate %214 by %c31_i32_56 dim 0 : vector<32x128xf32>, i32 -> vector<32x128xf32>
    %226 = vector.shape_cast %224 : vector<1x128xf32> to vector<1x128xf32>
    %227 = vector.broadcast %226 : vector<1x128xf32> to vector<32x128xf32>
    %228 = arith.select %17, %227, %225 : vector<32x128xi1>, vector<32x128xf32>
    %229 = arith.addf %203, %228 : vector<32x128xf32>
    %c2_57 = arith.constant 2 : index
    %230 = memref.load %arg2[%c2_57] : memref<3xf32, #tpu.memory_space<smem>>
    %c2_58 = arith.constant 2 : index
    %231 = memref.load %arg3[%c2_58] : memref<3xf32, #tpu.memory_space<smem>>
    %c0_59 = arith.constant 0 : index
    %c2_60 = arith.constant 2 : index
    %c0_61 = arith.constant 0 : index
    %c0_62 = arith.constant 0 : index
    %232 = vector.load %arg6[%c0_59, %c2_60, %c0_61, %c0_62] : memref<1x3x32x128xi8, #tpu.memory_space<vmem>>, vector<1x1x32x128xi8>
    %233 = vector.shape_cast %232 : vector<1x1x32x128xi8> to vector<32x128xi8>
    %234 = arith.uitofp %233 : vector<32x128xi8> to vector<32x128xf32>
    %235 = vector.broadcast %230 : f32 to vector<32x128xf32>
    %236 = arith.mulf %234, %235 : vector<32x128xf32>
    %237 = vector.broadcast %231 : f32 to vector<32x128xf32>
    %238 = arith.addf %236, %237 : vector<32x128xf32>
    %c0_63 = arith.constant 0 : index
    %c0_64 = arith.constant 0 : index
    %c2_65 = arith.constant 2 : index
    %c0_66 = arith.constant 0 : index
    %239 = vector.load %arg7[%c0_63, %c0_64, %c2_65, %c0_66] : memref<1x1x3x128xi8, #tpu.memory_space<vmem>>, vector<1x1x1x128xi8>
    %240 = vector.shape_cast %239 : vector<1x1x1x128xi8> to vector<1x128xi8>
    %241 = arith.uitofp %240 : vector<1x128xi8> to vector<1x128xf32>
    %242 = vector.broadcast %230 : f32 to vector<1x128xf32>
    %243 = arith.mulf %241, %242 : vector<1x128xf32>
    %244 = vector.broadcast %231 : f32 to vector<1x128xf32>
    %245 = arith.addf %243, %244 : vector<1x128xf32>
    %c0_67 = arith.constant 0 : index
    %c0_68 = arith.constant 0 : index
    %c2_69 = arith.constant 2 : index
    %c0_70 = arith.constant 0 : index
    %246 = vector.load %arg8[%c0_67, %c0_68, %c2_69, %c0_70] : memref<1x1x3x128xi8, #tpu.memory_space<vmem>>, vector<1x1x1x128xi8>
    %247 = vector.shape_cast %246 : vector<1x1x1x128xi8> to vector<1x128xi8>
    %248 = arith.uitofp %247 : vector<1x128xi8> to vector<1x128xf32>
    %249 = vector.broadcast %230 : f32 to vector<1x128xf32>
    %250 = arith.mulf %248, %249 : vector<1x128xf32>
    %251 = vector.broadcast %231 : f32 to vector<1x128xf32>
    %252 = arith.addf %250, %251 : vector<1x128xf32>
    %c1_i32_71 = arith.constant 1 : i32
    %253 = tpu.dynamic_rotate %238 by %c1_i32_71 dim 1 : vector<32x128xf32>, i32 -> vector<32x128xf32>
    %cst_72 = arith.constant 0.000000e+00 : f32
    %254 = vector.broadcast %cst_72 : f32 to vector<32x128xf32>
    %255 = arith.select %9, %253, %254 : vector<32x128xi1>, vector<32x128xf32>
    %c127_i32_73 = arith.constant 127 : i32
    %256 = tpu.dynamic_rotate %238 by %c127_i32_73 dim 1 : vector<32x128xf32>, i32 -> vector<32x128xf32>
    %cst_74 = arith.constant 0.000000e+00 : f32
    %257 = vector.broadcast %cst_74 : f32 to vector<32x128xf32>
    %258 = arith.select %11, %256, %257 : vector<32x128xi1>, vector<32x128xf32>
    %c1_i32_75 = arith.constant 1 : i32
    %259 = tpu.dynamic_rotate %245 by %c1_i32_75 dim 1 : vector<1x128xf32>, i32 -> vector<1x128xf32>
    %cst_76 = arith.constant 0.000000e+00 : f32
    %260 = vector.broadcast %cst_76 : f32 to vector<1x128xf32>
    %261 = arith.select %12, %259, %260 : vector<1x128xi1>, vector<1x128xf32>
    %c127_i32_77 = arith.constant 127 : i32
    %262 = tpu.dynamic_rotate %245 by %c127_i32_77 dim 1 : vector<1x128xf32>, i32 -> vector<1x128xf32>
    %cst_78 = arith.constant 0.000000e+00 : f32
    %263 = vector.broadcast %cst_78 : f32 to vector<1x128xf32>
    %264 = arith.select %13, %262, %263 : vector<1x128xi1>, vector<1x128xf32>
    %c1_i32_79 = arith.constant 1 : i32
    %265 = tpu.dynamic_rotate %252 by %c1_i32_79 dim 1 : vector<1x128xf32>, i32 -> vector<1x128xf32>
    %cst_80 = arith.constant 0.000000e+00 : f32
    %266 = vector.broadcast %cst_80 : f32 to vector<1x128xf32>
    %267 = arith.select %12, %265, %266 : vector<1x128xi1>, vector<1x128xf32>
    %c127_i32_81 = arith.constant 127 : i32
    %268 = tpu.dynamic_rotate %252 by %c127_i32_81 dim 1 : vector<1x128xf32>, i32 -> vector<1x128xf32>
    %cst_82 = arith.constant 0.000000e+00 : f32
    %269 = vector.broadcast %cst_82 : f32 to vector<1x128xf32>
    %270 = arith.select %13, %268, %269 : vector<1x128xi1>, vector<1x128xf32>
    %c18 = arith.constant 18 : index
    %271 = memref.load %arg4[%c18] : memref<27xf32, #tpu.memory_space<smem>>
    %c19 = arith.constant 19 : index
    %272 = memref.load %arg4[%c19] : memref<27xf32, #tpu.memory_space<smem>>
    %c20 = arith.constant 20 : index
    %273 = memref.load %arg4[%c20] : memref<27xf32, #tpu.memory_space<smem>>
    %274 = vector.broadcast %271 : f32 to vector<32x128xf32>
    %275 = arith.mulf %255, %274 : vector<32x128xf32>
    %276 = vector.broadcast %272 : f32 to vector<32x128xf32>
    %277 = arith.mulf %238, %276 : vector<32x128xf32>
    %278 = arith.addf %275, %277 : vector<32x128xf32>
    %279 = vector.broadcast %273 : f32 to vector<32x128xf32>
    %280 = arith.mulf %258, %279 : vector<32x128xf32>
    %281 = arith.addf %278, %280 : vector<32x128xf32>
    %282 = vector.broadcast %271 : f32 to vector<1x128xf32>
    %283 = arith.mulf %261, %282 : vector<1x128xf32>
    %284 = vector.broadcast %272 : f32 to vector<1x128xf32>
    %285 = arith.mulf %245, %284 : vector<1x128xf32>
    %286 = arith.addf %283, %285 : vector<1x128xf32>
    %287 = vector.broadcast %273 : f32 to vector<1x128xf32>
    %288 = arith.mulf %264, %287 : vector<1x128xf32>
    %289 = arith.addf %286, %288 : vector<1x128xf32>
    %290 = vector.broadcast %2 : f32 to vector<1x128xf32>
    %291 = arith.mulf %289, %290 : vector<1x128xf32>
    %c1_i32_83 = arith.constant 1 : i32
    %292 = tpu.dynamic_rotate %281 by %c1_i32_83 dim 0 : vector<32x128xf32>, i32 -> vector<32x128xf32>
    %293 = vector.shape_cast %291 : vector<1x128xf32> to vector<1x128xf32>
    %294 = vector.broadcast %293 : vector<1x128xf32> to vector<32x128xf32>
    %295 = arith.select %15, %294, %292 : vector<32x128xi1>, vector<32x128xf32>
    %296 = arith.addf %229, %295 : vector<32x128xf32>
    %c21 = arith.constant 21 : index
    %297 = memref.load %arg4[%c21] : memref<27xf32, #tpu.memory_space<smem>>
    %c22 = arith.constant 22 : index
    %298 = memref.load %arg4[%c22] : memref<27xf32, #tpu.memory_space<smem>>
    %c23 = arith.constant 23 : index
    %299 = memref.load %arg4[%c23] : memref<27xf32, #tpu.memory_space<smem>>
    %300 = vector.broadcast %297 : f32 to vector<32x128xf32>
    %301 = arith.mulf %255, %300 : vector<32x128xf32>
    %302 = vector.broadcast %298 : f32 to vector<32x128xf32>
    %303 = arith.mulf %238, %302 : vector<32x128xf32>
    %304 = arith.addf %301, %303 : vector<32x128xf32>
    %305 = vector.broadcast %299 : f32 to vector<32x128xf32>
    %306 = arith.mulf %258, %305 : vector<32x128xf32>
    %307 = arith.addf %304, %306 : vector<32x128xf32>
    %308 = arith.addf %296, %307 : vector<32x128xf32>
    %c24 = arith.constant 24 : index
    %309 = memref.load %arg4[%c24] : memref<27xf32, #tpu.memory_space<smem>>
    %c25 = arith.constant 25 : index
    %310 = memref.load %arg4[%c25] : memref<27xf32, #tpu.memory_space<smem>>
    %c26 = arith.constant 26 : index
    %311 = memref.load %arg4[%c26] : memref<27xf32, #tpu.memory_space<smem>>
    %312 = vector.broadcast %309 : f32 to vector<32x128xf32>
    %313 = arith.mulf %255, %312 : vector<32x128xf32>
    %314 = vector.broadcast %310 : f32 to vector<32x128xf32>
    %315 = arith.mulf %238, %314 : vector<32x128xf32>
    %316 = arith.addf %313, %315 : vector<32x128xf32>
    %317 = vector.broadcast %311 : f32 to vector<32x128xf32>
    %318 = arith.mulf %258, %317 : vector<32x128xf32>
    %319 = arith.addf %316, %318 : vector<32x128xf32>
    %320 = vector.broadcast %309 : f32 to vector<1x128xf32>
    %321 = arith.mulf %267, %320 : vector<1x128xf32>
    %322 = vector.broadcast %310 : f32 to vector<1x128xf32>
    %323 = arith.mulf %252, %322 : vector<1x128xf32>
    %324 = arith.addf %321, %323 : vector<1x128xf32>
    %325 = vector.broadcast %311 : f32 to vector<1x128xf32>
    %326 = arith.mulf %270, %325 : vector<1x128xf32>
    %327 = arith.addf %324, %326 : vector<1x128xf32>
    %328 = vector.broadcast %5 : f32 to vector<1x128xf32>
    %329 = arith.mulf %327, %328 : vector<1x128xf32>
    %c31_i32_84 = arith.constant 31 : i32
    %330 = tpu.dynamic_rotate %319 by %c31_i32_84 dim 0 : vector<32x128xf32>, i32 -> vector<32x128xf32>
    %331 = vector.shape_cast %329 : vector<1x128xf32> to vector<1x128xf32>
    %332 = vector.broadcast %331 : vector<1x128xf32> to vector<32x128xf32>
    %333 = arith.select %17, %332, %330 : vector<32x128xi1>, vector<32x128xf32>
    %334 = arith.addf %308, %333 : vector<32x128xf32>
    %c0_85 = arith.constant 0 : index
    %c0_86 = arith.constant 0 : index
    %c0_87 = arith.constant 0 : index
    %335 = vector.load %arg9[%c0_85, %c0_86, %c0_87] : memref<1x32x128xf32, #tpu.memory_space<vmem>>, vector<1x32x128xf32>
    %336 = vector.shape_cast %335 : vector<1x32x128xf32> to vector<32x128xf32>
    %337 = vector.shape_cast %334 : vector<32x128xf32> to vector<1x32x128xf32>
    tpu.vector_store %arg9[%c0_85, %c0_86, %c0_87], %337 {strides = array<i32>} : memref<1x32x128xf32, #tpu.memory_space<vmem>>, vector<1x32x128xf32>,
    return
  }
  func.func @transform_0(%arg0: i32, %arg1: i32) -> i32 {
    %c0_i32 = arith.constant 0 : i32
    %c0_i32_0 = arith.constant 0 : i32
    return %c0_i32 : i32
  }
  func.func @transform_1(%arg0: i32, %arg1: i32) -> i32 {
    %c0_i32 = arith.constant 0 : i32
    %c0_i32_0 = arith.constant 0 : i32
    return %c0_i32 : i32
  }
  func.func @transform_2(%arg0: i32, %arg1: i32) -> i32 {
    %c0_i32 = arith.constant 0 : i32
    %c0_i32_0 = arith.constant 0 : i32
    return %c0_i32 : i32
  }
  func.func @transform_3(%arg0: i32, %arg1: i32) -> i32 {
    %c0_i32 = arith.constant 0 : i32
    %c0_i32_0 = arith.constant 0 : i32
    return %c0_i32 : i32
  }
  func.func @transform_4(%arg0: i32, %arg1: i32) -> (i32, i32, i32, i32) {
    %c0_i32 = arith.constant 0 : i32
    %c0_i32_0 = arith.constant 0 : i32
    %c0_i32_1 = arith.constant 0 : i32
    return %arg0, %c0_i32, %arg1, %c0_i32_0 : i32, i32, i32, i32
  }
  func.func @transform_5(%arg0: i32, %arg1: i32) -> (i32, i32, i32, i32) {
    %c0_i32 = arith.constant 0 : i32
    %c0_i32_0 = arith.constant 0 : i32
    %c0_i32_1 = arith.constant 0 : i32
    return %arg0, %arg1, %c0_i32, %c0_i32_0 : i32, i32, i32, i32
  }
  func.func @transform_6(%arg0: i32, %arg1: i32) -> (i32, i32, i32, i32) {
    %c0_i32 = arith.constant 0 : i32
    %c0_i32_0 = arith.constant 0 : i32
    %c0_i32_1 = arith.constant 0 : i32
    return %arg0, %arg1, %c0_i32, %c0_i32_0 : i32, i32, i32, i32
  }
  func.func @transform_7(%arg0: i32, %arg1: i32) -> (i32, i32, i32) {
    %c0_i32 = arith.constant 0 : i32
    %c0_i32_0 = arith.constant 0 : i32
    return %arg0, %arg1, %c0_i32 : i32, i32, i32
  }
}

</mosaic_0001>

<bundles_post_ra>
// kernel: squeeze.1
= control target key start
LH: loop header
LB: loop body
LE: loop exit
PB: predicated region body
PF: predicated region fallthrough
CT: control target
= control target key end

     0   :  { %vm16_vm0 = vcmask 23552   ;;  %s84_s12 = smov 18   ;;  %s85_s13 = smov 21   ;;  %vm22_vm1 = vcmask 220352   ;;  %vm28_vm2 = vcmask 195752   ;;  %vm34_vm3 = vcmask 171152   ;;  %s113_s0 = inlined_call_operand.vmem [shape: f32[3,3,3], index: 0, kind: input, shape index: {}]   ;;  %s114_s1 = inlined_call_operand.vmem [shape: f32[27], index: 1, kind: output, shape index: {}]  }
   0x1   :  { %v73_v0 = vld [vmem:[%s113_s0 + $0x8] sm:$0xf]  ;;  %v74_v1 = vld [vmem:[%s113_s0 + $0x4] sm:$0xf]  ;;  %v13_v2 = vld [vmem:[%s113_s0] sm:$0xf] }
   0x2   :  { %8 = vst [vmem:[#allocation1 + $0x10] sm:$0xf] %v73_v0  ;;  %12 = vst [vmem:[#allocation1 + $0x8] sm:$0xf] %v74_v1  ;;  %s83_s0 = smov 24   ;;  %s86_s14 = smov 15  }
   0x3   :  { %14 = vst [vmem:[#allocation1] sm:$0xf] %v13_v2  ;;  %s87_s15 = smov 12   ;;  %s88_s16 = smov 9   ;;  %vm40_vm4 = vcmask 146552   ;;  %vm46_vm5 = vcmask 121952  }
   0x4   :  { %s89_s17 = smov 6   ;;  %s90_s18 = smov 3   ;;  %vm52_vm6 = vcmask 97352   ;;  %vm58_vm7 = vcmask 72752   ;;  %vm64_vm8 = vcmask 48152  }
   0x9   :  { %v19_v3 = vld [vmem:[#allocation1 + $0x12] sm:$0x1]   ;;  %v31_v4 = vld [vmem:[#allocation1 + $0x10] sm:$0x1]   ;;  %v25_v5 = vld [vmem:[#allocation1 + $0x11] sm:$0x1]  }
   0xa   :  { %20 = vrot.lane.b32.xlu0 %v19_v3, %s83_s0  ;;  %32 = vrot.lane.b32.xlu1 %v31_v4, %s84_s12  ;;  %v37_v6 = vld [vmem:[#allocation1 + $0xa] sm:$0x1]   ;;  %v15_v7 = vld [vmem:[#allocation1] sm:$0x1]   ;;  %v43_v8 = vld [vmem:[#allocation1 + $0x9] sm:$0x1]  }
   0xb   :  { %17 = vst.msk [vmem:[#allocation0] sm:$0x1] %vm16_vm0, %v15_v7   ;;  %v49_v9 = vld [vmem:[#allocation1 + $0x8] sm:$0x1]   ;;  %v55_v10 = vld [vmem:[#allocation1 + $0x2] sm:$0x1]  }
   0xc   :  { %v61_v11 = vld [vmem:[#allocation1 + $0x1] sm:$0x1]  }
   0xe   :  { %26 = vrot.lane.b32.xlu0 %v25_v5, %s85_s13  ;;  %38 = vrot.lane.b32.xlu1 %v37_v6, %s86_s14 }
  0x12   :  { %44 = vrot.lane.b32.xlu0 %v43_v8, %s87_s15  ;;  %50 = vrot.lane.b32.xlu1 %v49_v9, %s88_s16 }
  0x16   :  { %56 = vrot.lane.b32.xlu0 %v55_v10, %s89_s17  ;;  %62 = vrot.lane.b32.xlu1 %v61_v11, %s90_s18 }
  0x7c   :  { %v21_v12 = vpop.permute.xlu0 %20   ;;  %v33_v13 = vpop.permute.xlu1 %32  }
  0x7d   :  { %23 = vst.msk [vmem:[#allocation0] sm:$0x1] %vm22_vm1, %v21_v12  }
  0x80   :  { %v27_v14 = vpop.permute.xlu0 %26   ;;  %v39_v15 = vpop.permute.xlu1 %38  }
  0x81   :  { %29 = vst.msk [vmem:[#allocation0] sm:$0x1] %vm28_vm2, %v27_v14  }
  0x82   :  { %35 = vst.msk [vmem:[#allocation0] sm:$0x1] %vm34_vm3, %v33_v13  }
  0x83   :  { %41 = vst.msk [vmem:[#allocation0] sm:$0x1] %vm40_vm4, %v39_v15  }
  0x84   :  { %v45_v16 = vpop.permute.xlu0 %44   ;;  %v51_v17 = vpop.permute.xlu1 %50  }
  0x85   :  { %47 = vst.msk [vmem:[#allocation0] sm:$0x1] %vm46_vm5, %v45_v16  }
  0x86   :  { %53 = vst.msk [vmem:[#allocation0] sm:$0x1] %vm52_vm6, %v51_v17  }
  0x88   :  { %v57_v18 = vpop.permute.xlu0 %56   ;;  %v63_v19 = vpop.permute.xlu1 %62  }
  0x89   :  { %59 = vst.msk [vmem:[#allocation0] sm:$0x1] %vm58_vm7, %v57_v18  }
  0x8a   :  { %65 = vst.msk [vmem:[#allocation0] sm:$0x1] %vm64_vm8, %v63_v19  }
  0x91   :  { %v69_v20 = vld [vmem:[#allocation0] sm:$0x1] }
  0x92   :  { %71 = vst [vmem:[%s114_s1] sm:$0x1] %v69_v20 }

// kernel: model_wrapper_text_detection.1
= control target key start
LH: loop header
LB: loop body
LE: loop exit
PB: predicated region body
PF: predicated region fallthrough
CT: control target
= control target key end

     0   :  { %s2603_s0 = inlined_call_operand.vmem [shape: f32[3], index: 0, kind: input, shape index: {}]   ;;  %s2604_s1 = inlined_call_operand.vmem [shape: f32[3], index: 1, kind: input, shape index: {}]   ;;  %s2605_s2 = inlined_call_operand.vmem [shape: f32[27], index: 2, kind: input, shape index: {}]   ;;  %s2606_s3 = inlined_call_operand.<no memory space> [shape: f32[1], index: 3, kind: input, shape index: {}]   ;;  %s2607_s4 = inlined_call_operand.vmem [shape: u8[2,3,64,128], index: 4, kind: input, shape index: {}]   ;;  %s2608_s5 = inlined_call_operand.vmem [shape: u8[2,2,3,128], index: 5, kind: input, shape index: {}]   ;;  %s2609_s6 = inlined_call_operand.vmem [shape: u8[2,2,3,128], index: 6, kind: input, shape index: {}]   ;;  %s2610_s7 = inlined_call_operand.hbm [shape: f32[2,64,128], index: 7, kind: output, shape index: {}]  }
   0x1   :  { %2627 = sst [smem:[#allocation39_spill]] %s2603_s0 }
   0x2   :  { %2628 = sst [smem:[#allocation40_spill]] %s2604_s1 }
   0x3   :  { %2629 = sst [smem:[#allocation41_spill]] %s2605_s2 }
   0x4   :  { %2630 = sst [smem:[#allocation42_spill]] %s2607_s4 }
   0x5   :  { %12 = sst [smem:[#allocation2]] %s2606_s3 }
   0x6   :  { %13 = vsyncpa [#allocation5], 0 }
   0x7   :  { %14 = vsyncpa [#allocation7], 0 }
   0x8   :  { %15 = vsyncpa [#allocation4], 0 }
   0x9   :  { %17 = vsyncpa [#allocation4 + $0x1], 0  ;;  %s1645_s26 = smov 0   ;;  %s1647_s27 = smov 0  }
   0xa   :  { %s1649_s28 = smov 0   ;;  %s1651_s29 = smov 0  }
   0xb   :  { %s1653_s30 = smov 0   ;;  %s1655_s8 = smov 0  }
   0xc   :  { %s1657_s9 = smov 0   ;;  %s1659_s10 = smov 0  }
   0xd LB: > { %s1283_s3 = sadd.s32 4294967295, %s1592_s10   ;;  %s1284_s11 = sadd.s32 4294967294, %s1592_s10   ;;  %s1592_s10 = sphi %s1659_s10, %s23_s10   ;;  %s1588_s9 = sphi %s1657_s9, %s2706_s9   ;;  %s1584_s8 = sphi %s1655_s8, %s2705_s8   ;;  %s1580_s30 = sphi %s1653_s30, %s2704_s30   ;;  %s1576_s29 = sphi %s1651_s29, %s2703_s29   ;;  %s1572_s28 = sphi %s1649_s28, %s2702_s28   ;;  %s1568_s27 = sphi %s1647_s27, %s2701_s27   ;;  %s1564_s26 = sphi %s1645_s26, %s2700_s26  }
   0xe   : > { %s32_s12 = sadd.s32 1, %s1584_s8  ;;  %s35_s13 = sadd.s32 1, %s1588_s9 }
   0xf   : > { %p33_p0 = scmp.ge.s32.totalorder %s32_s12, 2  ;;  %s128_s14 = sadd.s32 1, %s1572_s28 }
  0x10   : > { %p135_p1 = scmp.ne.s32.totalorder %s1572_s28, %s1568_s27  ;;  %p136_p2 = scmp.eq.s32.totalorder %s1592_s10, 0 }
  0x11   : > { %s2708_s12 = smov (%p33_p0, %s32_s12), 0  ;;  %s2710_s13 = smov (!%p33_p0, %s35_s13), %s1588_s9 }
  0x12   : > { %2631 = sst [smem:[#allocation14_spill]] %s2708_s12  ;;  %s124_s15 = ssub.s32 %s1584_s8, %s2708_s12 }
  0x13   : > { %p1698_p3 = por %p136_p2, %p135_p1  ;;  %p37_p4 = scmp.ge.s32.totalorder %s2710_s13, 2 }
  0x14   : > { %p223_p5 = scmp.eq.s32.totalorder %s1283_s3, 3  ;;  %p228_p6 = scmp.ne.s32.totalorder %s1568_s27, %s1564_s26 }
  0x15   : > { %s2632_s16 = scalar_select %p1698_p3, 1, 0 }
  0x16   : > { %p229_p7 = scmp.eq.s32.totalorder %s1284_s11, 3  ;;  %s2712_s13 = smov (%p37_p4, %s2710_s13), 0 }
  0x17   : > { %2633 = sst [smem:[#allocation15_spill]] %s2712_s13  ;;  %p1706_p8 = por %p223_p5, %p135_p1 }
  0x18   : > { %p1710_p9 = por %p229_p7, %p228_p6  ;;  %s123_s19 = ssub.s32 %s1588_s9, %s2712_s13 }
  0x19   : > { %s2634_s17 = scalar_select %p1706_p8, 1, 0 }
  0x1a   : > { %s2635_s18 = scalar_select %p1710_p9, 1, 0 }
  0x1b   : > { %p1285_p10 = scmp.ge.s32.totalorder %s1592_s10, 1  ;;  %s125_s20 = sor.u32 %s124_s15, %s123_s19 }
  0x1c   : > { %p236_p11 = scmp.lt.s32.totalorder %s1592_s10, 5  ;;  %p126_p12 = scmp.eq.s32.totalorder %s125_s20, 0 }
  0x1d   : > { %p1722_p0 = scmp.eq.s32.totalorder %s1283_s3, 0  ;;  %s2638_s1 = sld [smem:[#allocation40_spill]] }
  0x1e   : > { %p1718_p13 = pnand %p1285_p10, %p236_p11 }
  0x1f   : > { %s2637_s22 = scalar_select %p1722_p0, 1, 0 }
  0x20   : > { %s2636_s21 = scalar_select %p1718_p13, 1, 0 }
  0x21   : > { %s1727_s23 = scalar_select %p126_p12, %s1572_s28, %s128_s14  }
  0x22   : > { %p1353_p1 = pneg %p1718_p13 }
  0x23   : > { %s260_s11 = sshll.u32 %s2638_s1, 4  ;;  %s261_s11 = int_to_ptr.vmem [resolvable:$true] %s260_s11 }
  0x24   : > { %p1736_p2 = pnand %p1722_p0, %p1353_p1  ;;  %s1445_s3 = scalar_lea.vmem %s261_s11, 16 }
  0x25   : > { %p1446_p4 = scmp.ne.s32.totalorder %s261_s11, %s1445_s3  ;;  %p1453_p10 = scmp.lt.s32.totalorder %s261_s11, %s261_s11 }
  0x26   : > { %p1447_p5 = pneg %p1736_p2  ;;  %p1454_p11 = scmp.lt.s32.totalorder %s1445_s3, %s1445_s3 }
  0x28   : > { %p1448_p6 = pnand %p1447_p5, %p1446_p4  ;;  %p1455_p12 = por %p1454_p11, %p1453_p10 }
  0x2a   : > { %p1449_p7 = pneg %p1448_p6 }
  0x2c   : > { %p1456_p9 = pnand %p1455_p12, %p1449_p7 }
  0x2e   : > { %1459 = shalt.err (!%p1456_p9)
}
  0x2f   : > { %s1594_s14 = smov [#allocation6]   ;;  %s2640_s0 = sld [smem:[#allocation39_spill]] }
  0x30   : > { %1359 = dma.vmem_to_smem (!%p1736_p2), %s261_s11, 16, %s1594_s14, [#allocation7]  }
  0x31   : > { %s2641_s2 = sld [smem:[#allocation41_spill]] }
  0x35   : > { %s249_s24 = sshll.u32 %s2640_s0, 4  ;;  %s250_s24 = int_to_ptr.vmem [resolvable:$true] %s249_s24 }
  0x36   : > { %s1460_s12 = scalar_lea.vmem %s250_s24, 16  ;;  %p1468_p6 = scmp.lt.s32.totalorder %s250_s24, %s250_s24 }
  0x37   : > { %s271_s13 = sshll.u32 %s2641_s2, 4  ;;  %p1461_p1 = scmp.ne.s32.totalorder %s250_s24, %s1460_s12  ;;  %s272_s13 = int_to_ptr.vmem [resolvable:$true] %s271_s13 }
  0x38   : > { %p1469_p7 = scmp.lt.s32.totalorder %s1460_s12, %s1460_s12 }
  0x39   : > { %p1463_p4 = pnand %p1461_p1, %p1447_p5 }
  0x3a   : > { %p1470_p10 = por %p1469_p7, %p1468_p6 }
  0x3b   : > { %p1464_p9 = pneg %p1463_p4 }
  0x3d   : > { %p1471_p11 = pnand %p1470_p10, %p1464_p9 }
  0x3f   : > { %1474 = shalt.err (!%p1471_p11)
}
  0x40   : > { %s1595_s11 = smov [#allocation3]   ;;  %s1475_s3 = scalar_lea.vmem %s272_s13, 16 }
  0x41   : > { %1356 = dma.vmem_to_smem (!%p1736_p2), %s250_s24, 16, %s1595_s11, [#allocation5]  }
  0x42   : > { %p1476_p12 = scmp.ne.s32.totalorder %s272_s13, %s1475_s3  ;;  %p1483_p13 = scmp.lt.s32.totalorder %s272_s13, %s272_s13 }
  0x43   : > { %p1484_p1 = scmp.lt.s32.totalorder %s1475_s3, %s1475_s3 }
  0x44   : > { %p1478_p8 = pnand %p1476_p12, %p1447_p5 }
  0x45   : > { %p1485_p4 = por %p1484_p1, %p1483_p13 }
  0x46   : > { %p1479_p0 = pneg %p1478_p8 }
  0x48   : > { %p1486_p3 = pnand %p1485_p4, %p1479_p0 }
  0x4a   : > { %1489 = shalt.err (!%p1486_p3)
}
  0x4b   : > { %s1596_s1 = smov [#allocation8]   ;;  %p1289_p9 = scmp.ge.s32.totalorder %s1592_s10, 4 }
  0x4c   : > { %1362 = dma.vmem_to_smem (!%p1736_p2), %s272_s13, 16, %s1596_s1, [#allocation7]  }
  0x4d   : > { %281 = sbr.rel (%p1289_p9) target bundleno = 95 (0x5f), region = 32  ;;  %p2642_p6 = scmp.ne.s32.totalorder (!%p1289_p9), %s2632_s16, 0 }
  0x54   : > { %284 = sbr.rel (!%p2642_p6) target bundleno = 95 (0x5f), region = 36  ;;  %s286_s12 = sand.u32 (%p2642_p6), 1, %s1572_s28  }
  0x55   : > { %s1337_s14 = smul.u32 (%p2642_p6), 6, %s1588_s9  ;;  %s2643_s4 = sld [smem:[#allocation42_spill]] (%p2642_p6) }
  0x56   : > { %s1336_s19 = smul.u32 (%p2642_p6), 24, %s286_s12 }
  0x57   : > { %s290_s20 = sadd.s32 (%p2642_p6), %s1584_s8, %s1337_s14 }
  0x58   : > { %s1290_s24 = sshll.u32 (%p2642_p6), %s290_s20, 3  ;;  %s288_s13 = scalar_lea.vmem (%p2642_p6), [#allocation9], %s1336_s19 }
  0x5b   : > { %s292_s3 = scalar_lea.vmem %s2643_s4, %s1290_s24 }
  0x5c   : > { %v324_v0 = vld [vmem:[%s292_s3] sm:$0xff]  ;;  %v326_v1 = vld [vmem:[%s292_s3 + $0x10] sm:$0xff] }
  0x5d   : > { %v328_v2 = vld [vmem:[%s292_s3 + $0x20] sm:$0xff]  ;;  %325 = vst [vmem:[%s288_s13] sm:$0xff] %v324_v0  ;;  %327 = vst [vmem:[%s288_s13 + $0x8] sm:$0xff] %v326_v1 }
  0x5e   : > { %329 = vst [vmem:[%s288_s13 + $0x10] sm:$0xff] %v328_v2 }
  0x5f PF: > { %p2644_p3 = scmp.ne.s32.totalorder %s2636_s21, 0 }
  0x61   : > { %358 = sbr.rel (%p2644_p3) target bundleno = 342 (0x156), region = 82 }
  0x68   : > { %p2645_p8 = scmp.ne.s32.totalorder %s2637_s22, 0 }
  0x6a   : > { %1551 = dma.done.wait (%p2645_p8), [#allocation5], 16  }
  0x6b   : > { %1553 = vsyncadd (%p2645_p8), [#allocation5], 4294967280 }
  0x6c   : > { %1555 = dma.done.wait (%p2645_p8), [#allocation7], 32  }
  0x6d   : > { %1557 = vsyncadd (%p2645_p8), [#allocation7], 4294967264  ;;  %s1783_s16 = sand.u32 1, %s1568_s27  }
  0x6e   : > { %s1338_s15 = smul.u32 24, %s1783_s16 }
  0x70   : > { %s1786_s1 = scalar_lea.vmem [#allocation9], %s1338_s15 }
  0x71   : > { %379 = sfence }
  0x72   : > { %s459_s21 = sld [smem:[#allocation3]]  ;;  %v461_v3 = vld [vmem:[%s1786_s1] sm:$0xff]  ;;  %p419_p13 = scmp.lt.s32.totalorder %s1580_s30, 1  ;;  %v1308_v30 = vld [vmem:[%s1786_s1 + $0x8] sm:$0xff]  ;;  %v440_v36 = vlaneseq }
  0x73   : > { %s460_s12 = sld [smem:[#allocation6]]  ;;  %v465_v4 = vunpack.c.3.s8 %v461_v3  ;;  %v462_v5 = vunpack.c.0.s8 %v461_v3  ;;  %v463_v6 = vunpack.c.1.s8 %v461_v3  ;;  %v464_v7 = vunpack.c.2.s8 %v461_v3  ;;  %p421_p0 = scmp.lt.s32.totalorder %s1576_s29, 1 }
  0x74   : > { %s420_s22 = scalar_select %p419_p13, %s1580_s30, 1  ;;  %v674_v32 = vunpack.c.0.s8 %v1308_v30  ;;  %v675_v37 = vunpack.c.1.s8 %v1308_v30  ;;  %v677_v40 = vunpack.c.3.s8 %v1308_v30  ;;  %v1828_v43 = vshrl.u32 %v440_v36, 7 }
  0x75   : > { %v469_v8 = vand.u32 255, %v465_v4  ;;  %v466_v9 = vand.u32 255, %v462_v5  ;;  %v467_v10 = vand.u32 255, %v463_v6  ;;  %v468_v11 = vand.u32 255, %v464_v7  ;;  %s422_s14 = scalar_select %p421_p0, %s1576_s29, 1  ;;  %v1320_v4 = vld [vmem:[%s1786_s1 + $0x10] sm:$0xff] }
  0x76   : > { %s1296_s19 = sshll.u32 %s420_s22, 1  ;;  %s1307_s22 = sld [smem:[#allocation6 + $0x1]]  ;;  %v678_v35 = vand.u32 255, %v674_v32  ;;  %v679_v44 = vand.u32 255, %v675_v37  ;;  %v676_v45 = vunpack.c.2.s8 %v1308_v30  ;;  %v681_v49 = vand.u32 255, %v677_v40 }
  0x77   : > { %v473_v12 = vcvt.s32.f32 %v469_v8  ;;  %v470_v13 = vcvt.s32.f32 %v466_v9  ;;  %v471_v14 = vcvt.s32.f32 %v467_v10  ;;  %v472_v15 = vcvt.s32.f32 %v468_v11  ;;  %s424_s20 = sadd.s32 %s1296_s19, %s422_s14  ;;  %s1598_s14 = smov 127  }
  0x78   : > { %v474_v16 = vstv %s459_s21  ;;  %s425_s11 = scalar_lea.vmem %s2608_s5, %s424_s20  ;;  %s432_s15 = scalar_lea.vmem %s2609_s6, %s424_s20  ;;  %v682_v42 = vcvt.s32.f32 %v678_v35  ;;  %v1839_v52 = vsub.s32 1, %v1828_v43  ;;  %v683_v53 = vcvt.s32.f32 %v679_v44 }
  0x79   : > { %v479_v17 = vstv %s460_s12  ;;  %v478_v18 = vmul.f32 %v474_v16, %v473_v12  ;;  %v475_v19 = vmul.f32 %v474_v16, %v470_v13  ;;  %v476_v20 = vmul.f32 %v474_v16, %v471_v14  ;;  %v484_v24 = vld [vmem:[%s425_s11] sm:$0x1]  ;;  %s1597_s21 = smov 1   ;;  %s1306_s12 = sld [smem:[#allocation3 + $0x1]] }
  0x7a   : > { %v477_v21 = vmul.f32 %v474_v16, %v472_v15  ;;  %v490_v25 = vld [vmem:[%s432_s15] sm:$0x1]  ;;  %v485_v26 = vunpack.c.0.s8 %v484_v24  ;;  %s1310_s19 = sld [smem:[#allocation8 + $0xa]]  ;;  %v685_v56 = vcvt.s32.f32 %v681_v49  ;;  %v680_v57 = vand.u32 255, %v676_v45  ;;  %s1316_s25 = sld [smem:[#allocation8 + $0x10]] }
  0x7b   : > { %v1801_v22 = vadd.f32 %v479_v17, %v478_v18  ;;  %v1803_v23 = vadd.f32 %v479_v17, %v475_v19  ;;  %v1809_v27 = vadd.f32 %v479_v17, %v476_v20  ;;  %v491_v29 = vunpack.c.0.s8 %v490_v25  ;;  %s1318_s20 = sld [smem:[#allocation3 + $0x2]]  ;;  %s1322_s1 = sld [smem:[#allocation8 + $0x13]] }
  0x7c   : > { %v1811_v28 = vadd.f32 %v479_v17, %v477_v21  ;;  %v486_v31 = vand.u32 255, %v485_v26  ;;  %v691_v50 = vstv %s1307_s22  ;;  %v684_v62 = vcvt.s32.f32 %v680_v57  ;;  %s1319_s24 = sld [smem:[#allocation6 + $0x2]]  ;;  %s1328_s11 = sld [smem:[#allocation8 + $0x19]] }
  0x7d   : > { %502 = vrot.lane.b32.xlu1 %v1801_v22, %s1597_s21  ;;  %496 = vrot.lane.b32.xlu0 %v1803_v23, %s1597_s21  ;;  %v492_v34 = vand.u32 255, %v491_v29  ;;  %v898_v6 = vunpack.c.0.s8 %v1320_v4  ;;  %v899_v11 = vunpack.c.1.s8 %v1320_v4  ;;  %v901_v12 = vunpack.c.3.s8 %v1320_v4  ;;  %s1298_s3 = sld [smem:[#allocation8 + $0x1]]  ;;  %s1301_s13 = sld [smem:[#allocation8 + $0x4]] }
  0x7e   : > { %v1818_v33 = vcvt.s32.f32 %v486_v31  ;;  %v900_v20 = vunpack.c.2.s8 %v1320_v4  ;;  %v1893_v30 = vsub.s32 2, %v1828_v43  ;;  %s1304_s15 = sld [smem:[#allocation8 + $0x7]]  ;;  %p434_p2 = scmp.gt.s32.totalorder %s1576_s29, 0  ;;  %v1962_v57 = vand.u32 127, %v440_v36 }
  0x7f   : > { %v1825_v39 = vcvt.s32.f32 %v492_v34  ;;  %v686_v41 = vstv %s1306_s12  ;;  %v902_v9 = vand.u32 255, %v898_v6  ;;  %v903_v18 = vand.u32 255, %v899_v11  ;;  %s532_s12 = sld [smem:[#allocation8]]  ;;  %s1300_s22 = sld [smem:[#allocation8 + $0x3]] }
  0x80   : > { %v488_v38 = vmul.f32 %v1818_v33, %v474_v16  ;;  %v696_v48 = vmul.f32 %v686_v41, %v1818_v33  ;;  %v687_v51 = vmul.f32 %v686_v41, %v682_v42  ;;  %v688_v58 = vmul.f32 %v686_v41, %v683_v53  ;;  %2647 = vst [vmem:[#allocation17_spill] sm:$0xff] %v1893_v30  ;;  %s1966_s0 = scalar_select %p421_p0, 1, 0 }
  0x81   : > { %498 = vrot.lane.b32.xlu1 %v1809_v27, %s1597_s21  ;;  %500 = vrot.lane.b32.xlu0 %v1811_v28, %s1597_s21  ;;  %v494_v47 = vmul.f32 %v1825_v39, %v474_v16  ;;  %v690_v61 = vmul.f32 %v686_v41, %v685_v56  ;;  %v1854_v63 = vstv %s1310_s19  ;;  %v689_v3 = vmul.f32 %v686_v41, %v684_v62  ;;  %s1303_s19 = sld [smem:[#allocation8 + $0x6]]  ;;  %s1968_s2 = sld [smem:[#allocation8 + $0xc]] }
  0x82   : > { %v1834_v46 = vadd.f32 %v488_v38, %v479_v17  ;;  %v697_v55 = vadd.f32 %v696_v48, %v691_v50  ;;  %v1851_v59 = vadd.f32 %v691_v50, %v687_v51  ;;  %v1859_v1 = vadd.f32 %v691_v50, %v688_v58  ;;  %s1970_s4 = sld [smem:[#allocation8 + $0xf]]  ;;  %p2696_p7 = scmp.ne.s32.totalorder %s2634_s17, 0 }
  0x83   : > { %v1845_v54 = vadd.f32 %v494_v47, %v479_v17  ;;  %v1864_v2 = vadd.f32 %v691_v50, %v690_v61  ;;  %v1873_v7 = vadd.f32 %v691_v50, %v689_v3  ;;  %v698_v8 = vmul.f32 %v686_v41, %v1825_v39 }
  0x84   : > { %v728_v60 = vrot.slane %v697_v55, %v1839_v52  ;;  %v1857_v0 = vmul.f32 %v1854_v63, %v697_v55  ;;  %v910_v10 = vstv %s1318_s20  ;;  %v906_v15 = vcvt.s32.f32 %v902_v9  ;;  %s1947_s20 = sld [smem:[#allocation8 + $0x2]] }
  0x85   : > { %514 = vrot.lane.b32.xlu1 %v1801_v22, %s1598_s14  ;;  %508 = vrot.lane.b32.xlu0 %v1803_v23, %s1598_s14  ;;  %v699_v13 = vadd.f32 %v698_v8, %v691_v50  ;;  %v920_v14 = vmul.f32 %v910_v10, %v1818_v33  ;;  %v915_v16 = vstv %s1319_s24  ;;  %v1880_v17 = vstv %s1316_s25  ;;  %s1953_s24 = sld [smem:[#allocation2]] }
  0x86   : > { %v905_v19 = vand.u32 255, %v901_v12  ;;  %v911_v29 = vmul.f32 %v910_v10, %v906_v15  ;;  %v1895_v31 = vstv %s1322_s1  ;;  %v907_v32 = vcvt.s32.f32 %v903_v18  ;;  %s1955_s25 = scalar_select %p434_p2, 1, 0 }
  0x87   : > { %v1887_v21 = vmul.f32 %v1880_v17, %v699_v13  ;;  %v921_v24 = vadd.f32 %v920_v14, %v915_v16  ;;  %v740_v26 = vrot.slane %v699_v13, %v1839_v52  ;;  %v904_v34 = vand.u32 255, %v900_v20  ;;  %s1957_s1 = sld [smem:[#allocation8 + $0x9]] }
  0x88   : > { %v909_v33 = vcvt.s32.f32 %v905_v19  ;;  %v1906_v38 = vadd.f32 %v915_v16, %v911_v29  ;;  %v912_v41 = vmul.f32 %v910_v10, %v907_v32  ;;  %v922_v50 = vmul.f32 %v910_v10, %v1825_v39 }
  0x89   : > { %512 = vrot.lane.b32.xlu1 %v1811_v28, %s1598_s14  ;;  %510 = vrot.lane.b32.xlu0 %v1809_v27, %s1598_s14  ;;  %2646 = vst [vmem:[#allocation16_spill] sm:$0xff] %v1887_v21  ;;  %v1902_v35 = vmul.f32 %v1895_v31, %v921_v24  ;;  %v952_v40 = vrot.slane %v921_v24, %v1893_v30  ;;  %v908_v44 = vcvt.s32.f32 %v904_v34  ;;  %v1939_v39 = vstv %s1328_s11  ;;  %s1959_s11 = sld [smem:[#allocation8 + $0xd]] }
  0x8a   : > { %v914_v42 = vmul.f32 %v910_v10, %v909_v33  ;;  %v1914_v45 = vadd.f32 %v915_v16, %v912_v41  ;;  %v923_v51 = vadd.f32 %v922_v50, %v915_v16  ;;  %v540_v58 = vstv %s1298_s3  ;;  %s436_s3 = scvt.s32.f32 %s1955_s25  ;;  %s2044_s25 = sld [smem:[#allocation8 + $0x18]] }
  0x8b   : > { %2648 = vst [vmem:[#allocation18_spill] sm:$0xff] %v1902_v35  ;;  %v913_v48 = vmul.f32 %v910_v10, %v908_v44  ;;  %v624_v61 = vstv %s1304_s15  ;;  %v1972_v62 = vstv %s532_s12  ;;  %v1974_v3 = vstv %s1300_s22  ;;  %s439_s15 = scvt.s32.f32 %s1966_s0  ;;  %s2001_s12 = sld [smem:[#allocation8 + $0xb]] }
  0x8c   : > { %v1916_v47 = vadd.f32 %v915_v16, %v914_v42  ;;  %v964_v53 = vrot.slane %v923_v51, %v1893_v30  ;;  %v1942_v55 = vmul.f32 %v1939_v39, %v923_v51  ;;  %v1976_v4 = vstv %s1303_s19  ;;  %s2015_s22 = sld [smem:[#allocation8 + $0xe]]  ;;  %s2017_s19 = sld [smem:[#allocation8 + $0x11]] }
  0x8d   : > { %523 = vrot.lane.b32.xlu1 %v1834_v46, %s1598_s14  ;;  %520 = vrot.lane.b32.xlu0 %v1834_v46, %s1597_s21  ;;  %v1922_v49 = vadd.f32 %v915_v16, %v913_v48  ;;  %v1979_v36 = vmul.f32 %v540_v58, %v1801_v22  ;;  %vm447_vm0 = vcmp.ge.s32.totalorder %v1962_v57, 1  ;;  %v1989_v8 = vmul.f32 %v624_v61, %v1801_v22  ;;  %s2031_s0 = sld [smem:[#allocation8 + $0x12]] }
  0x8e   : > { %2649 = vst [vmem:[#allocation19_spill] sm:$0xff] %v1942_v55  ;;  %v1992_v9 = vmul.f32 %v540_v58, %v1803_v23  ;;  %v1998_v11 = vmul.f32 %v624_v61, %v1803_v23  ;;  %v2004_v12 = vmul.f32 %v540_v58, %v1809_v27  ;;  %v2010_v13 = vmul.f32 %v624_v61, %v1809_v27 }
  0x8f   : > { %v2013_v14 = vstv %s1947_s20  ;;  %v2026_v16 = vmul.f32 %v624_v61, %v1811_v28  ;;  %s2033_s20 = sld [smem:[#allocation8 + $0x15]]  ;;  %v2039_v19 = vstv %s1953_s24  ;;  %v2041_v20 = vstv %s436_s3  ;;  %s1332_s24 = sshll.u32 %s1580_s30, 3 }
  0x90   : > { %v814_v24 = vstv %s1959_s11  ;;  %v2053_v29 = vmul.f32 %v624_v61, %v1845_v54  ;;  %v2055_v32 = vstv %s439_s15  ;;  %v2058_v33 = vstv %s1957_s1  ;;  %s1295_s1 = sshll.u32 %s1783_s16, 5 }
  0x91   : > { %529 = vrot.lane.b32.xlu1 %v1845_v54, %s1598_s14  ;;  %526 = vrot.lane.b32.xlu0 %v1845_v54, %s1597_s21  ;;  %v2062_v34 = vmul.f32 %v1854_v63, %v1851_v59  ;;  %v2068_v41 = vstv %s1970_s4  ;;  %v2075_v54 = vmul.f32 %v1880_v17, %v1851_v59  ;;  %v2079_v42 = vmul.f32 %v1854_v63, %v1859_v1  ;;  %s2272_s4 = sld [smem:[#allocation8 + $0x17]] }
  0x92   : > { %v2082_v44 = vmul.f32 %v814_v24, %v1859_v1  ;;  %v2086_v48 = vmul.f32 %v1880_v17, %v1859_v1  ;;  %v2090_v50 = vmul.f32 %v1854_v63, %v1864_v2  ;;  %vm448_vm1 = vcmp.le.s32.totalorder %v1962_v57, 98 }
  0x93   : > { %v2115_v61 = vmul.f32 %v1880_v17, %v1873_v7  ;;  %v2118_v56 = vstv %s2015_s22  ;;  %v2121_v37 = vstv %s2017_s19  ;;  %v2127_v55 = vstv %s2031_s0  ;;  %s1123_s22 = scalar_lea.sflag [#allocation4], %s1783_s16  ;;  %s1599_s0 = smov [#allocation10]  }
  0x94   : > { %2654 = vst [vmem:[#allocation24_spill] sm:$0xff] %v2118_v56  ;;  %2655 = vst [vmem:[#allocation25_spill] sm:$0xff] %v2121_v37  ;;  %v2145_v35 = vstv %s2044_s25  ;;  %v2149_v21 = vmul.f32 %v1939_v39, %v1906_v38  ;;  %vm569_vm2 = vcmp.lt.s32.totalorder %v1828_v43, 1  ;;  %vm653_vm3 = vcmp.lt.s32.totalorder %v1828_v43, 7 }
  0x95   : > { %700 = vrot.lane.b32.xlu1 %v1851_v59, %s1597_s21  ;;  %730 = vrot.lane.b32.xlu0 %v728_v60, %s1597_s21  ;;  %2653 = vst [vmem:[#allocation23_spill] sm:$0xff] %v2115_v61  ;;  %2656 = vst [vmem:[#allocation26_spill] sm:$0xff] %v2127_v55  ;;  %vm449_vm4 = vcmp.eq.s32.totalorder %v1828_v43, 0 }
  0x96   : > { %2660 = vst [vmem:[#allocation30_spill] sm:$0xff] %v2145_v35  ;;  %2661 = vst [vmem:[#allocation31_spill] sm:$0xff] %v2149_v21 }
  0x99   : > { %702 = vrot.lane.b32.xlu1 %v1859_v1, %s1597_s21  ;;  %706 = vrot.lane.b32.xlu0 %v1864_v2, %s1597_s21 }
  0x9d   : > { %733 = vrot.lane.b32.xlu1 %v728_v60, %s1598_s14  ;;  %704 = vrot.lane.b32.xlu0 %v1873_v7, %s1597_s21  ;;  %v594_v60 = vstv %s1301_s13  ;;  %s1985_s13 = sld [smem:[#allocation8 + $0x16]] }
  0x9e   : > { %v1982_v6 = vmul.f32 %v594_v60, %v1801_v22  ;;  %v1995_v10 = vmul.f32 %v594_v60, %v1803_v23  ;;  %v2007_v22 = vmul.f32 %v594_v60, %v1809_v27  ;;  %v2020_v23 = vmul.f32 %v540_v58, %v1811_v28 }
  0x9f   : > { %v2023_v15 = vmul.f32 %v594_v60, %v1811_v28  ;;  %v2047_v28 = vsub.s32 0, %v1828_v43  ;;  %v2111_v60 = vmul.f32 %v814_v24, %v1873_v7 }
  0xa1   : > { %718 = vrot.lane.b32.xlu1 %v1864_v2, %s1598_s14  ;;  %712 = vrot.lane.b32.xlu0 %v1851_v59, %s1598_s14  ;;  %2652 = vst [vmem:[#allocation22_spill] sm:$0xff] %v2111_v60 }
  0xa3   : > { %v2096_v51 = vstv %s1985_s13 }
  0xa5   : > { %716 = vrot.lane.b32.xlu1 %v1873_v7, %s1598_s14  ;;  %714 = vrot.lane.b32.xlu0 %v1859_v1, %s1598_s14  ;;  %v2108_v1 = vmul.f32 %v1854_v63, %v1873_v7  ;;  %v2131_v63 = vmul.f32 %v1895_v31, %v1906_v38  ;;  %v2138_v7 = vmul.f32 %v2096_v51, %v1906_v38 }
  0xa7   : > { %2651 = vst [vmem:[#allocation21_spill] sm:$0xff] %v2108_v1  ;;  %2657 = vst [vmem:[#allocation27_spill] sm:$0xff] %v2131_v63 }
  0xa8   : > { %2659 = vst [vmem:[#allocation29_spill] sm:$0xff] %v2138_v7 }
  0xa9   : > { %745 = vrot.lane.b32.xlu1 %v740_v26, %s1598_s14  ;;  %742 = vrot.lane.b32.xlu0 %v740_v26, %s1597_s21  ;;  %v2050_v26 = vmul.f32 %v540_v58, %v1834_v46  ;;  %v2071_v46 = vmul.f32 %v814_v24, %v1851_v59  ;;  %v2093_v59 = vmul.f32 %v814_v24, %v1864_v2  ;;  %v2104_v58 = vstv %s2001_s12 }
  0xaa   : > { %v2134_v24 = vstv %s2033_s20  ;;  %s1494_s20 = sshll.u32 %s1599_s0, 4  ;;  %s1495_s20 = int_to_ptr.vmem [resolvable:$false] %s1494_s20 }
  0xab   : > { %2658 = vst [vmem:[#allocation28_spill] sm:$0xff] %v2134_v24  ;;  %s1496_s25 = scalar_lea.vmem %s1495_s20, 1024 }
  0xad   : > { %924 = vrot.lane.b32.xlu1 %v1906_v38, %s1597_s21  ;;  %954 = vrot.lane.b32.xlu0 %v952_v40, %s1597_s21 }
  0xb1   : > { %926 = vrot.lane.b32.xlu1 %v1914_v45, %s1597_s21  ;;  %930 = vrot.lane.b32.xlu0 %v1916_v47, %s1597_s21 }
  0xb5   : > { %957 = vrot.lane.b32.xlu1 %v952_v40, %s1598_s14  ;;  %928 = vrot.lane.b32.xlu0 %v1922_v49, %s1597_s21  ;;  %v2065_v40 = vstv %s1968_s2  ;;  %s2215_s2 = sld [smem:[#allocation8 + $0x14]] }
  0xb9   : > { %942 = vrot.lane.b32.xlu1 %v1916_v47, %s1598_s14  ;;  %936 = vrot.lane.b32.xlu0 %v1906_v38, %s1598_s14  ;;  %v2163_v38 = vmul.f32 %v2096_v51, %v1914_v45 }
  0xbb   : > { %2663 = vst [vmem:[#allocation33_spill] sm:$0xff] %v2163_v38 }
  0xbd   : > { %940 = vrot.lane.b32.xlu1 %v1922_v49, %s1598_s14  ;;  %938 = vrot.lane.b32.xlu0 %v1914_v45, %s1598_s14 }
  0xc1   : > { %966 = vrot.lane.b32.xlu0 %v964_v53, %s1597_s21  ;;  %969 = vrot.lane.b32.xlu1 %v964_v53, %s1598_s14  ;;  %s1949_s21 = sld [smem:[#allocation8 + $0x5]]  ;;  %s1951_s14 = sld [smem:[#allocation8 + $0x8]]  ;;  %v2101_v53 = vmul.f32 %v1880_v17, %v1864_v2  ;;  %v2124_v2 = vadd.s32 24, %v1828_v43 }
  0xc3   : > { %2650 = vst [vmem:[#allocation20_spill] sm:$0xff] %v2101_v53  ;;  %vm456_vm5 = vcmp.eq.s32.totalorder %v2124_v2, 31 }
  0xc7   : > { %v2029_v27 = vstv %s1949_s21  ;;  %v2036_v18 = vstv %s1951_s14  ;;  %s2354_s21 = sld [smem:[#allocation8 + $0x1a]]  ;;  %s1331_s14 = sshll.u32 %s1576_s29, 2 }
  0xc8   : > { %s1135_s11 = sadd.s32 %s1332_s24, %s1331_s14  ;;  %s418_s29 = scalar_lea.vmem [#allocation10], %s1295_s1 }
  0xc9   : > { %s1138_s30 = sshll.u32 %s418_s29, 4  ;;  %s1333_s3 = sshll.u32 %s1135_s11, 7  ;;  %s2544_s30 = int_to_ptr.vmem [resolvable:$true] %s1138_s30 }
  0xca   : > { %s2549_s12 = scalar_lea.hbm %s2610_s7, %s1333_s3  ;;  %s1490_s19 = scalar_lea.vmem %s2544_s30, 512 }
  0xcb   : > { %p1491_p5 = scmp.ne.s32.totalorder %s2544_s30, %s1490_s19  ;;  %p1497_p12 = scmp.lt.s32.totalorder %s2544_s30, %s1495_s20 }
  0xcc   : > { %p1498_p1 = scmp.lt.s32.totalorder %s1496_s25, %s1490_s19 }
  0xcd   : > { %p1492_p10 = pnand %p1491_p5, %p2696_p7 }
  0xce   : > { %p1499_p4 = por %p1498_p1, %p1497_p12 }
  0xcf   : > { %p1493_p11 = pneg %p1492_p10 }
  0xd1   : > { %p1500_p9 = pnand %p1499_p4, %p1493_p11 }
  0xef   : > { %v503_v25 = vpop.permute.xlu1 %502  ;;  %v497_v5 = vpop.permute.xlu0 %496 }
  0xf0   : > { %v507_v17 = vsel %vm447_vm0, %v503_v25, 0.0  ;;  %v504_v30 = vsel %vm447_vm0, %v497_v5, 0.0  ;;  %v2159_v5 = vmul.f32 %v1895_v31, %v1914_v45 }
  0xf1   : > { %v539_v63 = vmul.f32 %v1972_v62, %v507_v17  ;;  %v593_v24 = vmul.f32 %v1974_v3, %v507_v17  ;;  %v623_v55 = vmul.f32 %v1976_v4, %v507_v17  ;;  %v536_v7 = vmul.f32 %v1972_v62, %v504_v30 }
  0xf2   : > { %v590_v37 = vmul.f32 %v1974_v3, %v504_v30  ;;  %v620_v25 = vmul.f32 %v1976_v4, %v504_v30  ;;  %2662 = vst [vmem:[#allocation32_spill] sm:$0xff] %v2159_v5 }
  0xf3   : > { %v548_v21 = vadd.f32 %v1979_v36, %v539_v63  ;;  %v602_v35 = vadd.f32 %v1982_v6, %v593_v24  ;;  %v632_v17 = vadd.f32 %v1989_v8, %v623_v55  ;;  %v545_v56 = vadd.f32 %v1992_v9, %v536_v7  ;;  %v499_v61 = vpop.permute.xlu1 %498  ;;  %v501_v60 = vpop.permute.xlu0 %500 }
  0xf4   : > { %v599_v30 = vadd.f32 %v1995_v10, %v590_v37  ;;  %v629_v1 = vadd.f32 %v1998_v11, %v620_v25  ;;  %v505_v5 = vsel %vm447_vm0, %v499_v61, 0.0  ;;  %v506_v38 = vsel %vm447_vm0, %v501_v60, 0.0 }
  0xf5   : > { %v537_v36 = vmul.f32 %v1972_v62, %v505_v5  ;;  %v591_v55 = vmul.f32 %v1974_v3, %v505_v5  ;;  %v621_v6 = vmul.f32 %v1976_v4, %v505_v5  ;;  %v538_v8 = vmul.f32 %v1972_v62, %v506_v38 }
  0xf6   : > { %v592_v37 = vmul.f32 %v1974_v3, %v506_v38  ;;  %v622_v9 = vmul.f32 %v1976_v4, %v506_v38  ;;  %v2185_v10 = vmul.f32 %v1939_v39, %v1914_v45  ;;  %v2189_v11 = vmul.f32 %v1895_v31, %v1916_v47 }
  0xf7   : > { %v546_v60 = vadd.f32 %v2004_v12, %v537_v36  ;;  %v600_v61 = vadd.f32 %v2007_v22, %v591_v55  ;;  %v630_v63 = vadd.f32 %v2010_v13, %v621_v6  ;;  %v547_v24 = vadd.f32 %v2020_v23, %v538_v8  ;;  %v515_v7 = vpop.permute.xlu1 %514  ;;  %v509_v3 = vpop.permute.xlu0 %508 }
  0xf8   : > { %2664 = vst [vmem:[#allocation34_spill] sm:$0xff] %v2185_v10  ;;  %2665 = vst [vmem:[#allocation35_spill] sm:$0xff] %v2189_v11  ;;  %v601_v25 = vadd.f32 %v2023_v15, %v592_v37  ;;  %v631_v5 = vadd.f32 %v2026_v16, %v622_v9  ;;  %v519_v45 = vsel %vm448_vm1, %v515_v7, 0.0  ;;  %v516_v38 = vsel %vm448_vm1, %v509_v3, 0.0 }
  0xf9   : > { %v553_v12 = vmul.f32 %v2013_v14, %v519_v45  ;;  %v607_v22 = vmul.f32 %v2029_v27, %v519_v45  ;;  %v637_v13 = vmul.f32 %v2036_v18, %v519_v45  ;;  %v550_v23 = vmul.f32 %v2013_v14, %v516_v38 }
  0xfa   : > { %v604_v36 = vmul.f32 %v2029_v27, %v516_v38  ;;  %v634_v15 = vmul.f32 %v2036_v18, %v516_v38  ;;  %v2209_v16 = vmul.f32 %v2096_v51, %v1916_v47  ;;  %v2213_v55 = vmul.f32 %v1939_v39, %v1916_v47 }
  0xfb   : > { %v557_v6 = vadd.f32 %v553_v12, %v548_v21  ;;  %v611_v8 = vadd.f32 %v607_v22, %v602_v35  ;;  %v641_v37 = vadd.f32 %v637_v13, %v632_v17  ;;  %v554_v9 = vadd.f32 %v550_v23, %v545_v56  ;;  %v513_v7 = vpop.permute.xlu1 %512  ;;  %v511_v3 = vpop.permute.xlu0 %510 }
  0xfc   : > { %2666 = vst [vmem:[#allocation36_spill] sm:$0xff] %v2209_v16  ;;  %2667 = vst [vmem:[#allocation37_spill] sm:$0xff] %v2213_v55  ;;  %v2217_v45 = vadd.f32 %v604_v36, %v599_v30  ;;  %v638_v11 = vadd.f32 %v634_v15, %v629_v1  ;;  %v518_v38 = vsel %vm448_vm1, %v513_v7, 0.0  ;;  %v517_v16 = vsel %vm448_vm1, %v511_v3, 0.0 }
  0xfd   : > { %v568_v10 = vrot.slane %v557_v6, 7  ;;  %v652_v47 = vrot.slane %v641_v37, 1  ;;  %v565_v55 = vrot.slane %v554_v9, 7  ;;  %v552_v53 = vmul.f32 %v2013_v14, %v518_v38 }
  0xfe   : > { %2668 = vst [vmem:[#allocation38_spill] sm:$0xff] %v2217_v45  ;;  %v649_v21 = vrot.slane %v638_v11, 1  ;;  %v606_v35 = vmul.f32 %v2029_v27, %v518_v38  ;;  %v636_v56 = vmul.f32 %v2036_v18, %v518_v38  ;;  %v551_v17 = vmul.f32 %v2013_v14, %v517_v16 }
  0xff   : > { %v2229_v1 = vsel %vm569_vm2, %v568_v10, %v565_v55  ;;  %v556_v30 = vadd.f32 %v552_v53, %v547_v24  ;;  %v605_v12 = vmul.f32 %v2029_v27, %v517_v16  ;;  %v635_v22 = vmul.f32 %v2036_v18, %v517_v16  ;;  %v524_v13 = vpop.permute.xlu1 %523  ;;  %v521_v23 = vpop.permute.xlu0 %520 }
 0x100   : > { %v2235_v11 = vsel %vm653_vm3, %v652_v47, %v649_v21  ;;  %v610_v36 = vadd.f32 %v606_v35, %v601_v25  ;;  %v640_v15 = vadd.f32 %v636_v56, %v631_v5  ;;  %v555_v6 = vadd.f32 %v551_v17, %v546_v60 }
 0x101   : > { %v567_v37 = vrot.slane %v556_v30, 7  ;;  %v609_v9 = vadd.f32 %v605_v12, %v600_v61  ;;  %v639_v7 = vadd.f32 %v635_v22, %v630_v63  ;;  %v525_v53 = vsel %vm448_vm1, %v524_v13, 0.0 }
 0x102   : > { %v651_v24 = vrot.slane %v640_v15, 1  ;;  %v566_v3 = vrot.slane %v555_v6, 7  ;;  %v522_v27 = vsel %vm447_vm0, %v521_v23, 0.0  ;;  %v2242_v16 = vstv %s2215_s2 }
 0x103   : > { %v570_v38 = vsel %vm569_vm2, %v567_v37, %v568_v10  ;;  %v650_v45 = vrot.slane %v639_v7, 1  ;;  %v561_v25 = vmul.f32 %v2013_v14, %v525_v53  ;;  %v558_v60 = vmul.f32 %v1972_v62, %v522_v27  ;;  %v530_v61 = vpop.permute.xlu1 %529  ;;  %v527_v63 = vpop.permute.xlu0 %526 }
 0x104   : > { %v585_v5 = vadd.f32 %v570_v38, %v2039_v19  ;;  %v654_v35 = vsel %vm653_vm3, %v651_v24, %v652_v47  ;;  %v571_v56 = vsel %vm569_vm2, %v566_v3, %v567_v37  ;;  %v572_v10 = vsel %vm569_vm2, %v565_v55, %v566_v3 }
 0x105   : > { %v583_v17 = vadd.f32 %v572_v10, %v2039_v19  ;;  %v584_v14 = vadd.f32 %v571_v56, %v2039_v19  ;;  %v655_v62 = vsel %vm653_vm3, %v650_v45, %v651_v24  ;;  %v2262_v30 = vsel %vm653_vm3, %v649_v21, %v650_v45 }
 0x106   : > { %v2264_v12 = vadd.f32 %v611_v8, %v585_v5  ;;  %v560_v47 = vadd.f32 %v2050_v26, %v558_v60  ;;  %v531_v22 = vsel %vm448_vm1, %v530_v61, 0.0  ;;  %v528_v55 = vsel %vm447_vm0, %v527_v63, 0.0 }
 0x107   : > { %v613_v13 = vadd.f32 %v609_v9, %v583_v17  ;;  %v614_v23 = vadd.f32 %v610_v36, %v584_v14  ;;  %v645_v15 = vmul.f32 %v2036_v18, %v531_v22  ;;  %v642_v45 = vmul.f32 %v1976_v4, %v528_v55  ;;  %v701_v8 = vpop.permute.xlu1 %700  ;;  %v731_v21 = vpop.permute.xlu0 %730 }
 0x108   : > { %v562_v6 = vadd.f32 %v561_v25, %v560_v47  ;;  %v708_v26 = vsel %vm447_vm0, %v701_v8, 0.0  ;;  %v732_v37 = vsel %vm447_vm0, %v731_v21, 0.0  ;;  %v2282_v7 = vmul.f32 %v1895_v31, %v1922_v49 }
 0x109   : > { %v2284_v53 = vadd.f32 %v655_v62, %v613_v13  ;;  %v644_v36 = vadd.f32 %v2053_v29, %v642_v45  ;;  %v752_v18 = vmul.f32 %v2058_v33, %v708_v26  ;;  %v810_v4 = vmul.f32 %v2065_v40, %v708_v26 }
 0x10a   : > { %v564_v9 = vmul.f32 %v2041_v20, %v562_v6  ;;  %v840_v24 = vmul.f32 %v2068_v41, %v708_v26  ;;  %v774_v3 = vmul.f32 %v2058_v33, %v732_v37  ;;  %v2292_v27 = vadd.f32 %v654_v35, %v614_v23  ;;  %v2670_v26 = vld [vmem:[#allocation20_spill] sm:$0xff] }
 0x10b   : > { %v646_v38 = vadd.f32 %v645_v15, %v644_v36  ;;  %v761_v31 = vadd.f32 %v2062_v34, %v752_v18  ;;  %v2296_v25 = vadd.f32 %v2071_v46, %v810_v4  ;;  %v703_v29 = vpop.permute.xlu1 %702  ;;  %v707_v60 = vpop.permute.xlu0 %706  ;;  %v2300_v61 = vmul.f32 %v2096_v51, %v1922_v49 }
 0x10c   : > { %v577_v63 = vrot.slane %v564_v9, %v2047_v28  ;;  %v849_v5 = vadd.f32 %v2075_v54, %v840_v24  ;;  %v2669_v35 = vrot.slane %v1857_v0, %v1839_v52  ;;  %v709_v34 = vsel %vm447_vm0, %v703_v29, 0.0 }
 0x10d   : > { %v648_v46 = vmul.f32 %v2055_v32, %v646_v38  ;;  %v753_v10 = vmul.f32 %v2058_v33, %v709_v34  ;;  %v811_v17 = vmul.f32 %v2065_v40, %v709_v34  ;;  %v841_v51 = vmul.f32 %v2068_v41, %v709_v34 }
 0x10e   : > { %v782_v56 = vadd.f32 %v2669_v35, %v774_v3  ;;  %v711_v14 = vsel %vm447_vm0, %v707_v60, 0.0  ;;  %v578_v54 = vsel %vm449_vm4, %v577_v63, %v2229_v1  ;;  %v2320_v0 = vmul.f32 %v1939_v39, %v1922_v49  ;;  %v2673_v60 = vld [vmem:[#allocation22_spill] sm:$0xff]  ;;  %v2674_v35 = vld [vmem:[#allocation23_spill] sm:$0xff] }
 0x10f   : > { %v2323_v62 = vstv %s2272_s4  ;;  %v661_v47 = vrot.slane %v648_v46, %v2047_v28  ;;  %v2327_v22 = vadd.f32 %v2079_v42, %v753_v10  ;;  %v2330_v55 = vadd.f32 %v2082_v44, %v811_v17  ;;  %v734_v23 = vpop.permute.xlu1 %733  ;;  %v705_v15 = vpop.permute.xlu0 %704  ;;  %v2675_v46 = vld [vmem:[#allocation24_spill] sm:$0xff]  ;;  %v2676_v17 = vld [vmem:[#allocation25_spill] sm:$0xff] }
 0x110   : > { %v2333_v13 = vadd.f32 %v2086_v48, %v841_v51  ;;  %v755_v1 = vmul.f32 %v2058_v33, %v711_v14  ;;  %v813_v49 = vmul.f32 %v2065_v40, %v711_v14  ;;  %v843_v39 = vmul.f32 %v2068_v41, %v711_v14 }
 0x111   : > { %v735_v45 = vsel %vm448_vm1, %v734_v23, 0.0  ;;  %v710_v44 = vsel %vm447_vm0, %v705_v15, 0.0  ;;  %v582_v8 = vadd.f32 %v578_v54, %v2039_v19  ;;  %v665_v48 = vsel %vm456_vm5, %v661_v47, %v2235_v11  ;;  %v2671_v19 = vld [vmem:[#allocation38_spill] sm:$0xff]  ;;  %v2672_v11 = vld [vmem:[#allocation21_spill] sm:$0xff] }
 0x112   : > { %v783_v42 = vmul.f32 %v2104_v58, %v735_v45  ;;  %v764_v21 = vadd.f32 %v2090_v50, %v755_v1  ;;  %v822_v6 = vadd.f32 %v2093_v59, %v813_v49  ;;  %v852_v37 = vadd.f32 %v2670_v26, %v843_v39 }
 0x113   : > { %v754_v36 = vmul.f32 %v2058_v33, %v710_v44  ;;  %v812_v4 = vmul.f32 %v2065_v40, %v710_v44  ;;  %v842_v9 = vmul.f32 %v2068_v41, %v710_v44  ;;  %v719_v24 = vpop.permute.xlu1 %718  ;;  %v713_v3 = vpop.permute.xlu0 %712  ;;  %v612_v38 = vadd.f32 %v2671_v19, %v582_v8 }
 0x114   : > { %v784_v18 = vadd.f32 %v783_v42, %v782_v56  ;;  %v723_v50 = vsel %vm448_vm1, %v719_v24, 0.0  ;;  %v720_v59 = vsel %vm448_vm1, %v713_v3, 0.0  ;;  %v669_v33 = vadd.f32 %v665_v48, %v2264_v12 }
 0x115   : > { %v763_v29 = vadd.f32 %v2672_v11, %v754_v36  ;;  %v821_v63 = vadd.f32 %v2673_v60, %v812_v4  ;;  %v851_v56 = vadd.f32 %v2674_v35, %v842_v9  ;;  %v769_v34 = vmul.f32 %v2104_v58, %v723_v50 }
 0x116   : > { %v785_v40 = vmul.f32 %v784_v18, %v2041_v20  ;;  %v827_v10 = vmul.f32 %v2675_v46, %v723_v50  ;;  %v857_v51 = vmul.f32 %v2676_v17, %v723_v50  ;;  %v666_v14 = vadd.f32 %v2262_v30, %v612_v38 }
 0x117   : > { %v766_v54 = vmul.f32 %v2104_v58, %v720_v59  ;;  %v773_v23 = vadd.f32 %v769_v34, %v764_v21  ;;  %v824_v12 = vmul.f32 %v2675_v46, %v720_v59  ;;  %v854_v15 = vmul.f32 %v2676_v17, %v720_v59  ;;  %v717_v1 = vpop.permute.xlu1 %716  ;;  %v715_v49 = vpop.permute.xlu0 %714 }
 0x118   : > { %v797_v47 = vrot.slane %v785_v40, %v2047_v28  ;;  %v831_v39 = vadd.f32 %v827_v10, %v822_v6  ;;  %v861_v45 = vadd.f32 %v857_v51, %v852_v37  ;;  %v722_v44 = vsel %vm448_vm1, %v717_v1, 0.0 }
 0x119   : > { %v770_v42 = vadd.f32 %v766_v54, %v761_v31  ;;  %v789_v8 = vrot.slane %v773_v23, 7  ;;  %v828_v30 = vadd.f32 %v824_v12, %v2296_v25  ;;  %v858_v48 = vadd.f32 %v854_v15, %v849_v5 }
 0x11a   : > { %v768_v26 = vmul.f32 %v2104_v58, %v722_v44  ;;  %v877_v21 = vrot.slane %v861_v45, 1  ;;  %v826_v18 = vmul.f32 %v2675_v46, %v722_v44  ;;  %v856_v4 = vmul.f32 %v2676_v17, %v722_v44  ;;  %v2677_v45 = vld [vmem:[#allocation26_spill] sm:$0xff] }
 0x11b   : > { %v786_v36 = vrot.slane %v770_v42, 7  ;;  %v874_v9 = vrot.slane %v858_v48, 1  ;;  %v721_v31 = vsel %vm448_vm1, %v715_v49, 0.0  ;;  %v746_v37 = vpop.permute.xlu1 %745  ;;  %v743_v24 = vpop.permute.xlu0 %742  ;;  %v2382_v3 = vstv %s2354_s21 }
 0x11c   : > { %v772_v6 = vadd.f32 %v768_v26, %v763_v29  ;;  %v830_v5 = vadd.f32 %v826_v18, %v821_v63  ;;  %v860_v19 = vadd.f32 %v856_v4, %v851_v56  ;;  %v767_v38 = vmul.f32 %v2104_v58, %v721_v31  ;;  %v2680_v26 = vld [vmem:[#allocation27_spill] sm:$0xff]  ;;  %v2681_v18 = vld [vmem:[#allocation28_spill] sm:$0xff] }
 0x11d   : > { %v793_v25 = vsel %vm569_vm2, %v789_v8, %v786_v36  ;;  %v2391_v29 = vsel %vm653_vm3, %v877_v21, %v874_v9  ;;  %v825_v59 = vmul.f32 %v2675_v46, %v721_v31  ;;  %v855_v34 = vmul.f32 %v2676_v17, %v721_v31 }
 0x11e   : > { %v798_v11 = vsel %vm449_vm4, %v797_v47, %v793_v25  ;;  %v788_v50 = vrot.slane %v772_v6, 7  ;;  %v876_v60 = vrot.slane %v860_v19, 1  ;;  %v771_v35 = vadd.f32 %v767_v38, %v2327_v22  ;;  %v2682_v6 = vld [vmem:[#allocation30_spill] sm:$0xff]  ;;  %v2683_v25 = vld [vmem:[#allocation29_spill] sm:$0xff]  ;;  %v2684_v38 = vld [vmem:[#allocation31_spill] sm:$0xff] }
 0x11f   : > { %v802_v40 = vadd.f32 %v798_v11, %v666_v14  ;;  %v829_v58 = vadd.f32 %v825_v59, %v2330_v55  ;;  %v747_v56 = vsel %vm448_vm1, %v746_v37, 0.0  ;;  %v744_v10 = vsel %vm447_vm0, %v743_v24, 0.0  ;;  %v925_v51 = vpop.permute.xlu1 %924  ;;  %v955_v54 = vpop.permute.xlu0 %954 }
 0x120   : > { %v790_v63 = vsel %vm569_vm2, %v788_v50, %v789_v8  ;;  %v2405_v22 = vsel %vm653_vm3, %v876_v60, %v877_v21  ;;  %v787_v47 = vrot.slane %v771_v35, 7  ;;  %v859_v23 = vadd.f32 %v855_v34, %v2333_v13  ;;  %v2678_v8 = vld [vmem:[#allocation16_spill] sm:$0xff] }
 0x121   : > { %v832_v46 = vadd.f32 %v828_v30, %v802_v40  ;;  %v805_v14 = vadd.f32 %v790_v63, %v669_v33  ;;  %v871_v12 = vmul.f32 %v2676_v17, %v747_v56  ;;  %v862_v55 = vmul.f32 %v2068_v41, %v744_v10  ;;  %v2685_v63 = vld [vmem:[#allocation18_spill] sm:$0xff] }
 0x122   : > { %v932_v15 = vsel %vm447_vm0, %v925_v51, 0.0  ;;  %v791_v49 = vsel %vm569_vm2, %v787_v47, %v788_v50  ;;  %v792_v33 = vsel %vm569_vm2, %v786_v36, %v787_v47  ;;  %v875_v17 = vrot.slane %v859_v23, 1 }
 0x123   : > { %v2412_v1 = vadd.f32 %v831_v39, %v805_v14  ;;  %v976_v42 = vmul.f32 %v2677_v45, %v932_v15  ;;  %v803_v44 = vadd.f32 %v792_v33, %v2284_v53  ;;  %v804_v13 = vadd.f32 %v791_v49, %v2292_v27  ;;  %v927_v48 = vpop.permute.xlu1 %926  ;;  %v931_v39 = vpop.permute.xlu0 %930  ;;  %v2689_v49 = vld [vmem:[#allocation33_spill] sm:$0xff] }
 0x124   : > { %v2679_v41 = vrot.slane %v2678_v8, %v1839_v52  ;;  %v1034_v4 = vmul.f32 %v2681_v18, %v932_v15  ;;  %v1064_v31 = vmul.f32 %v2682_v6, %v932_v15  ;;  %v956_v36 = vsel %vm447_vm0, %v955_v54, 0.0 }
 0x125   : > { %v985_v21 = vadd.f32 %v2680_v26, %v976_v42  ;;  %v833_v37 = vadd.f32 %v829_v58, %v803_v44  ;;  %v2429_v53 = vadd.f32 %v830_v5, %v804_v13  ;;  %v879_v27 = vsel %vm653_vm3, %v875_v17, %v876_v60  ;;  %v2686_v58 = vld [vmem:[#allocation17_spill] sm:$0xff]  ;;  %v2690_v44 = vld [vmem:[#allocation34_spill] sm:$0xff] }
 0x126   : > { %v870_v30 = vadd.f32 %v2679_v41, %v862_v55  ;;  %v880_v52 = vsel %vm653_vm3, %v874_v9, %v875_v17  ;;  %v1043_v19 = vadd.f32 %v2683_v25, %v1034_v4  ;;  %v1073_v11 = vadd.f32 %v2684_v38, %v1064_v31  ;;  %v2688_v55 = vld [vmem:[#allocation32_spill] sm:$0xff]  ;;  %v2691_v17 = vld [vmem:[#allocation35_spill] sm:$0xff] }
 0x127   : > { %v998_v50 = vmul.f32 %v2677_v45, %v956_v36  ;;  %v2438_v59 = vadd.f32 %v879_v27, %v833_v37  ;;  %v933_v40 = vsel %vm447_vm0, %v927_v48, 0.0  ;;  %v935_v5 = vsel %vm447_vm0, %v931_v39, 0.0  ;;  %v958_v35 = vpop.permute.xlu1 %957  ;;  %v929_v60 = vpop.permute.xlu0 %928  ;;  %v2692_v41 = vld [vmem:[#allocation36_spill] sm:$0xff]  ;;  %v2693_v48 = vld [vmem:[#allocation37_spill] sm:$0xff] }
 0x128   : > { %v872_v24 = vadd.f32 %v871_v12, %v870_v30  ;;  %v890_v34 = vadd.f32 %v880_v52, %v832_v46  ;;  %v2687_v56 = vrot.slane %v2685_v63, %v2686_v58  ;;  %v977_v51 = vmul.f32 %v2677_v45, %v933_v40 }
 0x129   : > { %v1035_v54 = vmul.f32 %v2681_v18, %v933_v40  ;;  %v1065_v14 = vmul.f32 %v2682_v6, %v933_v40  ;;  %v979_v47 = vmul.f32 %v2677_v45, %v935_v5  ;;  %v1037_v23 = vmul.f32 %v2681_v18, %v935_v5 }
 0x12a   : > { %v873_v9 = vmul.f32 %v872_v24, %v2055_v32  ;;  %v1006_v10 = vadd.f32 %v2687_v56, %v998_v50  ;;  %v1067_v12 = vmul.f32 %v2682_v6, %v935_v5  ;;  %v2456_v15 = vadd.f32 %v2688_v55, %v977_v51 }
 0x12b   : > { %v2459_v33 = vadd.f32 %v2689_v49, %v1035_v54  ;;  %v959_v42 = vsel %vm448_vm1, %v958_v35, 0.0  ;;  %v2464_v13 = vadd.f32 %v2690_v44, %v1065_v14  ;;  %v988_v8 = vadd.f32 %v2691_v17, %v979_v47  ;;  %v943_v26 = vpop.permute.xlu1 %942  ;;  %v937_v4 = vpop.permute.xlu0 %936 }
 0x12c   : > { %v885_v46 = vrot.slane %v873_v9, %v2047_v28  ;;  %v1046_v30 = vadd.f32 %v2692_v41, %v1037_v23  ;;  %v1076_v39 = vadd.f32 %v2693_v48, %v1067_v12  ;;  %v1007_v31 = vmul.f32 %v2242_v16, %v959_v42 }
 0x12d   : > { %v934_v36 = vsel %vm447_vm0, %v929_v60, 0.0  ;;  %v947_v37 = vsel %vm448_vm1, %v943_v26, 0.0  ;;  %v944_v27 = vsel %vm448_vm1, %v937_v4, 0.0  ;;  %v892_v44 = vadd.f32 %v2405_v22, %v2429_v53 }
 0x12e   : > { %v978_v52 = vmul.f32 %v2677_v45, %v934_v36  ;;  %v1036_v24 = vmul.f32 %v2681_v18, %v934_v36  ;;  %v1066_v25 = vmul.f32 %v2682_v6, %v934_v36  ;;  %v993_v38 = vmul.f32 %v2242_v16, %v947_v37 }
 0x12f   : > { %v1008_v50 = vadd.f32 %v1007_v31, %v1006_v10  ;;  %v1051_v40 = vmul.f32 %v2323_v62, %v947_v37  ;;  %v1081_v5 = vmul.f32 %v2382_v3, %v947_v37  ;;  %v990_v35 = vmul.f32 %v2242_v16, %v944_v27  ;;  %v939_v56 = vpop.permute.xlu0 %938  ;;  %v941_v10 = vpop.permute.xlu1 %940 }
 0x130   : > { %v987_v60 = vadd.f32 %v2282_v7, %v978_v52  ;;  %v1045_v9 = vadd.f32 %v2300_v61, %v1036_v24  ;;  %v1075_v63 = vadd.f32 %v2320_v0, %v1066_v25  ;;  %v997_v45 = vadd.f32 %v993_v38, %v988_v8 }
 0x131   : > { %v1009_v18 = vmul.f32 %v1008_v50, %v2041_v20  ;;  %v1055_v51 = vadd.f32 %v1051_v40, %v1046_v30  ;;  %v1085_v54 = vadd.f32 %v1081_v5, %v1076_v39  ;;  %v994_v14 = vadd.f32 %v990_v35, %v985_v21  ;;  %v2694_v5 = vld [vmem:[#allocation19_spill] sm:$0xff] }
 0x132   : > { %v1013_v47 = vrot.slane %v997_v45, 7  ;;  %v1048_v23 = vmul.f32 %v2323_v62, %v944_v27  ;;  %v1078_v12 = vmul.f32 %v2382_v3, %v944_v27  ;;  %v889_v7 = vsel %vm456_vm5, %v885_v46, %v2391_v29 }
 0x133   : > { %v1021_v61 = vrot.slane %v1009_v18, %v2047_v28  ;;  %v1101_v0 = vrot.slane %v1085_v54, 1  ;;  %v1010_v55 = vrot.slane %v994_v14, 7  ;;  %v893_v49 = vadd.f32 %v889_v7, %v2412_v1  ;;  %v967_v17 = vpop.permute.xlu0 %966  ;;  %v970_v26 = vpop.permute.xlu1 %969 }
 0x134   : > { %v1052_v20 = vadd.f32 %v1048_v23, %v1043_v19  ;;  %v1082_v42 = vadd.f32 %v1078_v12, %v1073_v11  ;;  %v946_v21 = vsel %vm448_vm1, %v941_v10, 0.0  ;;  %v945_v11 = vsel %vm448_vm1, %v939_v56, 0.0 }
 0x135   : > { %v1017_v8 = vsel %vm569_vm2, %v1013_v47, %v1010_v55  ;;  %v992_v29 = vmul.f32 %v2242_v16, %v946_v21  ;;  %v1050_v46 = vmul.f32 %v2323_v62, %v946_v21  ;;  %v1080_v41 = vmul.f32 %v2382_v3, %v946_v21 }
 0x136   : > { %v1022_v1 = vsel %vm449_vm4, %v1021_v61, %v1017_v8  ;;  %v1098_v19 = vrot.slane %v1082_v42, 1  ;;  %v968_v22 = vsel %vm447_vm0, %v967_v17, 0.0  ;;  %v991_v31 = vmul.f32 %v2242_v16, %v945_v11 }
 0x137   : > { %v1026_v53 = vadd.f32 %v1022_v1, %v890_v34  ;;  %v996_v30 = vadd.f32 %v992_v29, %v987_v60  ;;  %v1054_v48 = vadd.f32 %v1050_v46, %v1045_v9  ;;  %v1084_v39 = vadd.f32 %v1080_v41, %v1075_v63 }
 0x138   : > { %v1105_v4 = vsel %vm653_vm3, %v1101_v0, %v1098_v19  ;;  %v1049_v36 = vmul.f32 %v2323_v62, %v945_v11  ;;  %v1079_v37 = vmul.f32 %v2382_v3, %v945_v11  ;;  %v1086_v34 = vmul.f32 %v2682_v6, %v968_v22 }
 0x139   : > { %v1056_v27 = vadd.f32 %v1052_v20, %v1026_v53  ;;  %v1012_v52 = vrot.slane %v996_v30, 7  ;;  %v1100_v24 = vrot.slane %v1084_v39, 1  ;;  %v995_v25 = vadd.f32 %v991_v31, %v2456_v15 }
 0x13a   : > { %v1053_v38 = vadd.f32 %v1049_v36, %v2459_v33  ;;  %v1083_v50 = vadd.f32 %v1079_v37, %v2464_v13  ;;  %v971_v16 = vsel %vm448_vm1, %v970_v26, 0.0  ;;  %v2695_v35 = vrot.slane %v2694_v5, %v2686_v58 }
 0x13b   : > { %v1014_v62 = vsel %vm569_vm2, %v1012_v52, %v1013_v47  ;;  %v1102_v40 = vsel %vm653_vm3, %v1100_v24, %v1101_v0  ;;  %v1095_v6 = vmul.f32 %v2382_v3, %v971_v16  ;;  %v1011_v33 = vrot.slane %v995_v25, 7 }
 0x13c   : > { %v1094_v60 = vadd.f32 %v2695_v35, %v1086_v34  ;;  %v1029_v15 = vadd.f32 %v1014_v62, %v893_v49  ;;  %v1099_v13 = vrot.slane %v1083_v50, 1 }
 0x13d   : > { %v1015_v63 = vsel %vm569_vm2, %v1011_v33, %v1012_v52  ;;  %v1016_v45 = vsel %vm569_vm2, %v1010_v55, %v1011_v33 }
 0x13e   : > { %v1096_v57 = vadd.f32 %v1095_v6, %v1094_v60  ;;  %v1059_v9 = vadd.f32 %v1055_v51, %v1029_v15  ;;  %v1103_v58 = vsel %vm653_vm3, %v1099_v13, %v1100_v24  ;;  %v1027_v3 = vadd.f32 %v1016_v45, %v2438_v59 }
 0x13f   : > { %v1028_v56 = vadd.f32 %v1015_v63, %v892_v44  ;;  %v1104_v18 = vsel %vm653_vm3, %v1098_v19, %v1099_v13 }
 0x140   : > { %v1097_v54 = vmul.f32 %v1096_v57, %v2055_v32  ;;  %v1114_v14 = vadd.f32 %v1104_v18, %v1056_v27  ;;  %v1057_v51 = vadd.f32 %v1053_v38, %v1027_v3 }
 0x141   : > { %v1058_v10 = vadd.f32 %v1054_v48, %v1028_v56 }
 0x142   : > { %v1109_v47 = vrot.slane %v1097_v54, %v2047_v28  ;;  %1118 = vst [vmem:[%s418_s29] sm:$0xff] %v1114_v14  ;;  %v1115_v23 = vadd.f32 %v1103_v58, %v1057_v51 }
 0x143   : > { %v1116_v12 = vadd.f32 %v1102_v40, %v1058_v10 }
 0x144   : > { %v1113_v59 = vsel %vm456_vm5, %v1109_v47, %v1105_v4  ;;  %1119 = vst [vmem:[%s418_s29 + $0x8] sm:$0xff] %v1115_v23 }
 0x145   : > { %v1117_v43 = vadd.f32 %v1113_v59, %v1059_v9  ;;  %1120 = vst [vmem:[%s418_s29 + $0x10] sm:$0xff] %v1116_v12 }
 0x147   : > { %1121 = vst [vmem:[%s418_s29 + $0x18] sm:$0xff] %v1117_v43 }
 0x148   : > { %1503 = shalt.err (!%p1500_p9)
}
 0x149   : > { %s1504_s2 = scalar_lea.hbm %s2549_s12, 512  ;;  %s1508_s14 = scalar_lea.hbm %s2610_s7, 2048 }
 0x14a   : > { %p1505_p6 = scmp.ne.s32.totalorder %s2549_s12, %s1504_s2  ;;  %p1509_p13 = scmp.lt.u32.totalorder %s2549_s12, %s2610_s7 }
 0x14b   : > { %p1510_p0 = scmp.lt.u32.totalorder %s1508_s14, %s1504_s2  ;;  %p1512_p5 = scmp.lt.u32.totalorder %s1504_s2, %s2549_s12 }
 0x14c   : > { %p1506_p3 = pnand %p1505_p6, %p2696_p7 }
 0x14d   : > { %p1511_p2 = por %p1510_p0, %p1509_p13 }
 0x14e   : > { %p1507_p8 = pneg %p1506_p3 }
 0x14f   : > { %p1513_p10 = por %p1512_p5, %p1511_p2 }
 0x151   : > { %p1514_p11 = pnand %p1513_p10, %p1507_p8 }
 0x153   : > { %1517 = shalt.err (!%p1514_p11)
}
 0x154   : > { %s1600_s11 = smov 128   ;;  %s1601_s29 = smov 8  }
 0x155   : > { %1351 = dma.vmem_to_hbm [thread:$0]  (%p2696_p7), %s2544_s30, 512, %s2549_s12, %s1123_s22, %s1600_s11, %s1600_s11, %s1601_s29  }
 0x156 PF: > { %p1373_p12 = scmp.ge.s32.totalorder %s1592_s10, 2  ;;  %s1153_s3 = sand.u32 1, %s1564_s26  }
 0x157   : > { %p2697_p1 = scmp.ne.s32.totalorder %s2635_s18, 0  ;;  %s1154_s13 = scalar_lea.sflag [#allocation4], %s1153_s3 }
 0x159   : > { %p1364_p4 = pnand %p1373_p12, %p2697_p1 }
 0x15b   : > { %1559 = dma.done.wait (!%p1364_p4), %s1154_s13, 512  }
 0x15c   : > { %1561 = vsyncadd (!%p1364_p4), %s1154_s13, 4294966784  ;;  %s23_s10 = sadd.s32 1, %s1592_s10   ;;  %s2698_s17 = sld [smem:[#allocation14_spill]] }
 0x15d   : > { %p20_p9 = scmp.ge.s32.totalorder %s23_s10, 6   ;;  %s2699_s16 = sld [smem:[#allocation15_spill]] }
 0x15e   : > { %s2700_s26 = smov %s1568_s27  ;;  %s2701_s27 = smov %s1572_s28 }
 0x15f   : > { %s2702_s28 = smov %s1727_s23  ;;  %s2703_s29 = smov %s1584_s8 }
 0x160   : > { %s2704_s30 = smov %s1588_s9  ;;  %22 = sbr.rel (!%p20_p9) target bundleno = 13 (0xd), region = 147 }
 0x162   : > { %s2705_s8 = smov %s2698_s17 }
 0x163   : > { %s2706_s9 = smov %s2699_s16 }
 0x167   :  { %1159 = vsyncpa [#allocation4], 1 }
 0x168   :  { %1161 = vsyncpa [#allocation4 + $0x1], 1 }
 0x169   :  { %1162 = vsyncpa [#allocation5], 1 }
 0x16a   :  { %1164 = vsyncpa [#allocation5 + $0x1], 1 }
 0x16b   :  { %1165 = vsyncpa [#allocation7], 1 }

</bundles_post_ra>
